<compile_context>
chip_gen: v6e
topology: v6e:2x2x1
jax: 0.10.0
libtpu: 0.0.40
codegen_flags: <defaults>
</compile_context>

<pallas_src>
import math

import jax
import jax.numpy as jnp
from jax.experimental import pallas as pl
from jax.experimental.pallas import tpu as pltpu

PACK = 8  # batch rows packed into the lane dimension (t3=16 feats * 8 = 128 lanes)


def _cdiv(a, b):
    return (a + b - 1) // b


def _round_up(x, m):
    return ((x + m - 1) // m) * m


def _softplus(x):
    # Numerically stable softplus: max(x, 0) + log(1 + exp(-|x|)).  exp/log land on the EUP.
    return jnp.maximum(x, 0.0) + jnp.log(1.0 + jnp.exp(-jnp.abs(x)))


def generative_net_kernel(zp_ref, yp_ref, w1_ref, w2_ref, wy_ref, prm_ref,
                          xr1_ref, xr2_ref, xr3_ref, ymv_ref):
    # Packed widths (derived from ref shapes, all static).
    c1 = zp_ref.shape[1]   # PACK * t3  (128)
    c2 = w1_ref.shape[1]   # PACK * t2  (256)
    c3 = w2_ref.shape[1]   # PACK * t1  (512)

    zp = zp_ref[...]

    # x_rec1 = softplus(BN_pxz(z))          (BN folded to scale/shift rows 0,1)
    xr1 = _softplus(zp * prm_ref[0:1, :c1] + prm_ref[1:2, :c1])
    xr1_ref[...] = xr1.astype(xr1_ref.dtype)

    # z_2 = softplus(BN_dec1(z @ W_dec1))   (BN scale folded into W1 columns; shift = row 2)
    h2 = jnp.dot(zp, w1_ref[...], preferred_element_type=jnp.float32)
    z2 = _softplus(h2 + prm_ref[2:3, :c2])

    # x_rec2 = softplus(BN_pxz1(z_2))       (rows 3,4)
    xr2 = _softplus(z2 * prm_ref[3:4, :c2] + prm_ref[4:5, :c2])
    xr2_ref[...] = xr2.astype(xr2_ref.dtype)

    # z_3 = softplus(BN_dec2(z_2 @ W_dec2)) (BN scale folded into W2 columns; shift = row 5)
    h3 = jnp.dot(z2, w2_ref[...], preferred_element_type=jnp.float32)
    z3 = _softplus(h3 + prm_ref[5:6, :c3])

    # x_rec3 = softplus(BN_pxz2(z_3))       (rows 6,7)
    xr3 = _softplus(z3 * prm_ref[6:7, :c3] + prm_ref[7:8, :c3])
    xr3_ref[...] = xr3.astype(xr3_ref.dtype)

    # Fused y path: one matmul with [kron(I8,W_mu) | kron(I8,W_var)], bias = row 8.
    yh = jnp.dot(yp_ref[...], wy_ref[...], preferred_element_type=jnp.float32) \
        + prm_ref[8:9, :2 * c1]
    ymv_ref[:, :c1] = yh[:, :c1].astype(ymv_ref.dtype)            # y_mean (packed)
    ymv_ref[:, c1:] = jnp.exp(yh[:, c1:]).astype(ymv_ref.dtype)   # y_var  (packed)


def _fold_bn(bn_params, eps=1e-5):
    """(gamma, beta, running_mean, running_var) -> (scale, shift) per feature."""
    gamma, beta, mean, var = (jnp.asarray(a, jnp.float32) for a in bn_params)
    scale = gamma / jnp.sqrt(var + eps)
    shift = beta - mean * scale
    return scale, shift


def _choose_tile_pack(n_pack, tile_rows):
    """Pick the packed-row tile: multiple of 8, big, >=2 (preferably even) grid steps."""
    req = max(8, ((tile_rows // PACK) // 8) * 8)
    if n_pack <= 16:
        return _round_up(max(n_pack, 1), 8)
    if n_pack <= req:
        return _round_up(_cdiv(n_pack, 2), 8)          # 2 steps -> both v7x TensorCores
    steps = _cdiv(n_pack, req)
    if steps % 2:
        steps += 1                                      # even step count for 2-TC chips
    return _round_up(_cdiv(n_pack, steps), 8)


def generative_net_forward(z, y3, params, *, tile_rows=4096):
    """z: (N, t3), y3: (N, y_dim) -> dict matching GenerativeNet.forward output."""
    n, t3 = z.shape
    y_dim = y3.shape[-1]

    w_dec1 = jnp.asarray(params["w_dec1"], jnp.float32)   # (t3, t2)
    w_dec2 = jnp.asarray(params["w_dec2"], jnp.float32)   # (t2, t1)
    t2 = w_dec1.shape[1]
    t1 = w_dec2.shape[1]
    w_mu = jnp.asarray(params["w_mu"], jnp.float32)        # (y_dim, t3)
    w_var = jnp.asarray(params["w_var"], jnp.float32)
    b_mu = jnp.asarray(params["b_mu"], jnp.float32)
    b_var = jnp.asarray(params["b_var"], jnp.float32)

    s_pxz, b_pxz = _fold_bn(params["bn_pxz"])
    s_d1, sh_d1 = _fold_bn(params["bn_dec1"])
    s_pxz1, b_pxz1 = _fold_bn(params["bn_pxz1"])
    s_d2, sh_d2 = _fold_bn(params["bn_dec2"])
    s_pxz2, b_pxz2 = _fold_bn(params["bn_pxz2"])

    # Block-diagonal (lane-dense) weights; BN_dec* scale folded into columns.
    eye = jnp.eye(PACK, dtype=jnp.float32)
    w1_big = jnp.kron(eye, w_dec1 * s_d1[None, :])                     # (PACK*t3, PACK*t2)
    w2_big = jnp.kron(eye, w_dec2 * s_d2[None, :])                     # (PACK*t2, PACK*t1)
    wy_big = jnp.concatenate([jnp.kron(eye, w_mu), jnp.kron(eye, w_var)], axis=1)

    c1, c2, c3 = PACK * t3, PACK * t2, PACK * t1
    wmax = max(c1, c2, c3, 2 * c1, 128)

    def _row(v):
        v = jnp.tile(jnp.asarray(v, jnp.float32), PACK)
        return jnp.pad(v, (0, wmax - v.shape[0]))

    y_bias = jnp.concatenate([jnp.tile(b_mu, PACK), jnp.tile(b_var, PACK)])
    prm = jnp.stack([
        _row(s_pxz), _row(b_pxz),                       # 0,1  BN_pxz  scale/shift (c1)
        _row(sh_d1),                                    # 2    BN_dec1 shift       (c2)
        _row(s_pxz1), _row(b_pxz1),                     # 3,4  BN_pxz1 scale/shift (c2)
        _row(sh_d2),                                    # 5    BN_dec2 shift       (c3)
        _row(s_pxz2), _row(b_pxz2),                     # 6,7  BN_pxz2 scale/shift (c3)
        jnp.pad(y_bias, (0, wmax - y_bias.shape[0])),   # 8    [b_mu | b_var]      (2*c1)
    ], axis=0)
    prm = jnp.pad(prm, ((0, 16 - prm.shape[0]), (0, 0)))   # single (16, wmax) param slab

    # Pack 8 consecutive batch rows into the lane dimension (free, row-major reshape).
    n_pack = max(1, _cdiv(n, PACK))
    tile_pack = _choose_tile_pack(n_pack, tile_rows)
    n_pack_pad = _round_up(n_pack, tile_pack)
    n_pad = n_pack_pad * PACK
    if n_pad != n:
        pad = n_pad - n
        z = jnp.pad(z, ((0, pad), (0, 0)))
        y3 = jnp.pad(y3, ((0, pad), (0, 0)))
    zp = z.astype(jnp.float32).reshape(n_pack_pad, c1)
    yp = y3.astype(jnp.float32).reshape(n_pack_pad, PACK * y_dim)

    grid = (n_pack_pad // tile_pack,)

    def rows_spec(c):
        return pl.BlockSpec((tile_pack, c), lambda i: (i, 0))

    def const_spec(a):
        return pl.BlockSpec(a.shape, lambda i: (0, 0))

    out_shape = (
        jax.ShapeDtypeStruct((n_pack_pad, c1), jnp.float32),       # x_rec1 slab
        jax.ShapeDtypeStruct((n_pack_pad, c2), jnp.float32),       # x_rec2 slab
        jax.ShapeDtypeStruct((n_pack_pad, c3), jnp.float32),       # x_rec3 slab
        jax.ShapeDtypeStruct((n_pack_pad, 2 * c1), jnp.float32),   # [y_mean | y_var] slab
    )

    xr1, xr2, xr3, ymv = pl.pallas_call(
        generative_net_kernel,
        out_shape=out_shape,
        grid_spec=pltpu.PrefetchScalarGridSpec(
            num_scalar_prefetch=0,
            grid=grid,
            in_specs=[
                rows_spec(c1),               # packed z rows
                rows_spec(PACK * y_dim),     # packed y rows
                const_spec(w1_big),          # resident block-diagonal weights
                const_spec(w2_big),
                const_spec(wy_big),
                const_spec(prm),             # consolidated BN / bias slab
            ],
            out_specs=(rows_spec(c1), rows_spec(c2), rows_spec(c3), rows_spec(2 * c1)),
        ),
        compiler_params=pltpu.CompilerParams(
            dimension_semantics=("parallel",),
            vmem_limit_bytes=32 * 1024 * 1024,
        ),
    )(zp, yp, w1_big, w2_big, wy_big, prm)

    return {
        "x_rec1": xr1.reshape(n_pad, t3)[:n],
        "x_rec2": xr2.reshape(n_pad, t2)[:n],
        "x_rec3": xr3.reshape(n_pad, t1)[:n],
        "y_mean": ymv[:, :c1].reshape(n_pad, t3)[:n],
        "y_var": ymv[:, c1:].reshape(n_pad, t3)[:n],
    }


if __name__ == "__main__":
    # Small shapes consistent with the module: topic_num_1=64, topic_num_2=32,
    # topic_num_3=16, y_dim=10.  batch=520 deliberately not a tile/pack multiple
    # to exercise the padding path; yields a 2-step grid.
    topic_num_1, topic_num_2, topic_num_3 = 64, 32, 16
    y_dim = 10
    batch = 520

    key = jax.random.PRNGKey(0)
    keys = jax.random.split(key, 14)

    # CustomizedLinear with all-ones mask + reset_params_pos -> positive weights, no bias.
    bd1 = 1.0 / math.sqrt(topic_num_3)
    bd2 = 1.0 / math.sqrt(topic_num_2)
    w_dec1 = jax.random.uniform(keys[0], (topic_num_3, topic_num_2), jnp.float32, 0.0, bd1)
    w_dec2 = jax.random.uniform(keys[1], (topic_num_2, topic_num_1), jnp.float32, 0.0, bd2)

    lb = 1.0 / math.sqrt(y_dim)
    w_mu = jax.random.uniform(keys[2], (y_dim, topic_num_3), jnp.float32, -lb, lb)
    b_mu = jax.random.uniform(keys[3], (topic_num_3,), jnp.float32, -lb, lb)
    w_var = jax.random.uniform(keys[4], (y_dim, topic_num_3), jnp.float32, -lb, lb)
    b_var = jax.random.uniform(keys[5], (topic_num_3,), jnp.float32, -lb, lb)

    def make_bn(k, c):
        k1, k2, k3, k4 = jax.random.split(k, 4)
        gamma = jax.random.uniform(k1, (c,), jnp.float32, 0.5, 1.5)
        beta = 0.1 * jax.random.normal(k2, (c,), jnp.float32)
        running_mean = 0.1 * jax.random.normal(k3, (c,), jnp.float32)
        running_var = 0.5 + jnp.abs(jax.random.normal(k4, (c,), jnp.float32))
        return (gamma, beta, running_mean, running_var)

    params = {
        "w_dec1": w_dec1, "w_dec2": w_dec2,
        "w_mu": w_mu, "b_mu": b_mu, "w_var": w_var, "b_var": b_var,
        "bn_pxz":  make_bn(keys[6], topic_num_3),
        "bn_dec1": make_bn(keys[7], topic_num_2),
        "bn_pxz1": make_bn(keys[8], topic_num_2),
        "bn_dec2": make_bn(keys[9], topic_num_1),
        "bn_pxz2": make_bn(keys[10], topic_num_1),
    }

    z = jax.random.normal(keys[11], (batch, topic_num_3), jnp.float32)
    y3 = jax.random.normal(keys[12], (batch, y_dim), jnp.float32)

    out = generative_net_forward(z, y3, params, tile_rows=4096)
    jax.block_until_ready(out)

    # Pure-JAX reference (eval-mode BatchNorm, softplus non-linearity).
    def ref_softplus(x):
        return jnp.logaddexp(x, 0.0)

    def ref_bn(x, p, eps=1e-5):
        gamma, beta, mean, var = p
        return gamma * (x - mean) / jnp.sqrt(var + eps) + beta

    out1_ref = ref_softplus(ref_bn(z, params["bn_pxz"]))
    z2_ref = ref_softplus(ref_bn(z @ w_dec1, params["bn_dec1"]))
    out2_ref = ref_softplus(ref_bn(z2_ref, params["bn_pxz1"]))
    z3_ref = ref_softplus(ref_bn(z2_ref @ w_dec2, params["bn_dec2"]))
    out3_ref = ref_softplus(ref_bn(z3_ref, params["bn_pxz2"]))
    ymu_ref = y3 @ w_mu + b_mu
    yvar_ref = jnp.exp(y3 @ w_var + b_var)

    tol = dict(atol=1e-4, rtol=1e-4)
    assert jnp.allclose(out["x_rec1"], out1_ref, **tol)
    assert jnp.allclose(out["x_rec2"], out2_ref, **tol)
    assert jnp.allclose(out["x_rec3"], out3_ref, **tol)
    assert jnp.allclose(out["y_mean"], ymu_ref, **tol)
    assert jnp.allclose(out["y_var"], yvar_ref, **tol)
    assert out["x_rec1"].shape == (batch, topic_num_3)
    assert out["x_rec2"].shape == (batch, topic_num_2)
    assert out["x_rec3"].shape == (batch, topic_num_1)
    assert out["y_mean"].shape == (batch, topic_num_3)
    assert out["y_var"].shape == (batch, topic_num_3)

    print("KERNEL_OK")
</pallas_src>

<mosaic_0001>
module attributes {stable_mosaic.version = 11 : i64} {
  func.func @generative_net_kernel(%arg0: i32, %arg1: memref<40x128xf32, #tpu.memory_space<vmem>>, %arg2: memref<40x80xf32, #tpu.memory_space<vmem>>, %arg3: memref<128x256xf32, #tpu.memory_space<vmem>>, %arg4: memref<256x512xf32, #tpu.memory_space<vmem>>, %arg5: memref<80x256xf32, #tpu.memory_space<vmem>>, %arg6: memref<16x512xf32, #tpu.memory_space<vmem>>, %arg7: memref<40x128xf32, #tpu.memory_space<vmem>>, %arg8: memref<40x256xf32, #tpu.memory_space<vmem>>, %arg9: memref<40x512xf32, #tpu.memory_space<vmem>>, %arg10: memref<40x256xf32, #tpu.memory_space<vmem>>) attributes {dimension_semantics = [#tpu.dimension_semantics<parallel>], iteration_bounds = array<i64: 2>, scalar_prefetch = 0 : i64, scratch_operands = 0 : i64, tpu.core_type = #tpu.core_type<tc>, window_params = [{transform_indices = @transform_0, window_bounds = array<i64: 40, 128>}, {transform_indices = @transform_1, window_bounds = array<i64: 40, 80>}, {pipeline_mode = #tpu.pipeline_mode<synchronous>, transform_indices = @transform_2, window_bounds = array<i64: 128, 256>}, {pipeline_mode = #tpu.pipeline_mode<synchronous>, transform_indices = @transform_3, window_bounds = array<i64: 256, 512>}, {pipeline_mode = #tpu.pipeline_mode<synchronous>, transform_indices = @transform_4, window_bounds = array<i64: 80, 256>}, {pipeline_mode = #tpu.pipeline_mode<synchronous>, transform_indices = @transform_5, window_bounds = array<i64: 16, 512>}, {transform_indices = @transform_6, window_bounds = array<i64: 40, 128>}, {transform_indices = @transform_7, window_bounds = array<i64: 40, 256>}, {transform_indices = @transform_8, window_bounds = array<i64: 40, 512>}, {transform_indices = @transform_9, window_bounds = array<i64: 40, 256>}]} {
    %c0 = arith.constant 0 : index
    %c0_0 = arith.constant 0 : index
    %0 = vector.load %arg1[%c0, %c0_0] : memref<40x128xf32, #tpu.memory_space<vmem>>, vector<40x128xf32>
    %c0_1 = arith.constant 0 : index
    %c0_2 = arith.constant 0 : index
    %1 = vector.load %arg6[%c0_1, %c0_2] : memref<16x512xf32, #tpu.memory_space<vmem>>, vector<1x128xf32>
    %2 = vector.broadcast %1 : vector<1x128xf32> to vector<40x128xf32>
    %3 = arith.mulf %0, %2 : vector<40x128xf32>
    %c1 = arith.constant 1 : index
    %c0_3 = arith.constant 0 : index
    %4 = vector.load %arg6[%c1, %c0_3] : memref<16x512xf32, #tpu.memory_space<vmem>>, vector<1x128xf32>
    %5 = vector.broadcast %4 : vector<1x128xf32> to vector<40x128xf32>
    %6 = arith.addf %3, %5 : vector<40x128xf32>
    %cst = arith.constant 0.000000e+00 : f32
    %7 = vector.broadcast %cst : f32 to vector<40x128xf32>
    %8 = arith.maximumf %6, %7 : vector<40x128xf32>
    %9 = math.absf %6 : vector<40x128xf32>
    %cst_4 = arith.constant 0.000000e+00 : f32
    %10 = vector.broadcast %cst_4 : f32 to vector<40x128xf32>
    %11 = arith.subf %10, %9 : vector<40x128xf32>
    %12 = math.exp %11 : vector<40x128xf32>
    %cst_5 = arith.constant 1.000000e+00 : f32
    %13 = vector.broadcast %cst_5 : f32 to vector<40x128xf32>
    %14 = arith.addf %13, %12 : vector<40x128xf32>
    %15 = math.log %14 : vector<40x128xf32>
    %16 = arith.addf %8, %15 : vector<40x128xf32>
    %c0_6 = arith.constant 0 : index
    %c0_7 = arith.constant 0 : index
    %17 = vector.load %arg7[%c0_6, %c0_7] : memref<40x128xf32, #tpu.memory_space<vmem>>, vector<40x128xf32>
    tpu.vector_store %arg7[%c0_6, %c0_7], %16 {strides = array<i32>} : memref<40x128xf32, #tpu.memory_space<vmem>>, vector<40x128xf32>,
    %c0_8 = arith.constant 0 : index
    %c0_9 = arith.constant 0 : index
    %18 = vector.load %arg3[%c0_8, %c0_9] : memref<128x256xf32, #tpu.memory_space<vmem>>, vector<128x256xf32>
    %cst_10 = arith.constant dense<0.000000e+00> : vector<40x256xf32>
    %19 = tpu.matmul %0, %18, %cst_10 {dimension_numbers = #tpu.dot_dimension_numbers<[1], [0], [0], [1], [0, 0, 1, 1], [], []>} : vector<40x128xf32>, vector<128x256xf32>, vector<40x256xf32> -> vector<40x256xf32>
    %c2 = arith.constant 2 : index
    %c0_11 = arith.constant 0 : index
    %20 = vector.load %arg6[%c2, %c0_11] : memref<16x512xf32, #tpu.memory_space<vmem>>, vector<1x256xf32>
    %21 = vector.broadcast %20 : vector<1x256xf32> to vector<40x256xf32>
    %22 = arith.addf %19, %21 : vector<40x256xf32>
    %cst_12 = arith.constant 0.000000e+00 : f32
    %23 = vector.broadcast %cst_12 : f32 to vector<40x256xf32>
    %24 = arith.maximumf %22, %23 : vector<40x256xf32>
    %25 = math.absf %22 : vector<40x256xf32>
    %cst_13 = arith.constant 0.000000e+00 : f32
    %26 = vector.broadcast %cst_13 : f32 to vector<40x256xf32>
    %27 = arith.subf %26, %25 : vector<40x256xf32>
    %28 = math.exp %27 : vector<40x256xf32>
    %cst_14 = arith.constant 1.000000e+00 : f32
    %29 = vector.broadcast %cst_14 : f32 to vector<40x256xf32>
    %30 = arith.addf %29, %28 : vector<40x256xf32>
    %31 = math.log %30 : vector<40x256xf32>
    %32 = arith.addf %24, %31 : vector<40x256xf32>
    %c3 = arith.constant 3 : index
    %c0_15 = arith.constant 0 : index
    %33 = vector.load %arg6[%c3, %c0_15] : memref<16x512xf32, #tpu.memory_space<vmem>>, vector<1x256xf32>
    %34 = vector.broadcast %33 : vector<1x256xf32> to vector<40x256xf32>
    %35 = arith.mulf %32, %34 : vector<40x256xf32>
    %c4 = arith.constant 4 : index
    %c0_16 = arith.constant 0 : index
    %36 = vector.load %arg6[%c4, %c0_16] : memref<16x512xf32, #tpu.memory_space<vmem>>, vector<1x256xf32>
    %37 = vector.broadcast %36 : vector<1x256xf32> to vector<40x256xf32>
    %38 = arith.addf %35, %37 : vector<40x256xf32>
    %cst_17 = arith.constant 0.000000e+00 : f32
    %39 = vector.broadcast %cst_17 : f32 to vector<40x256xf32>
    %40 = arith.maximumf %38, %39 : vector<40x256xf32>
    %41 = math.absf %38 : vector<40x256xf32>
    %cst_18 = arith.constant 0.000000e+00 : f32
    %42 = vector.broadcast %cst_18 : f32 to vector<40x256xf32>
    %43 = arith.subf %42, %41 : vector<40x256xf32>
    %44 = math.exp %43 : vector<40x256xf32>
    %cst_19 = arith.constant 1.000000e+00 : f32
    %45 = vector.broadcast %cst_19 : f32 to vector<40x256xf32>
    %46 = arith.addf %45, %44 : vector<40x256xf32>
    %47 = math.log %46 : vector<40x256xf32>
    %48 = arith.addf %40, %47 : vector<40x256xf32>
    %c0_20 = arith.constant 0 : index
    %c0_21 = arith.constant 0 : index
    %49 = vector.load %arg8[%c0_20, %c0_21] : memref<40x256xf32, #tpu.memory_space<vmem>>, vector<40x256xf32>
    tpu.vector_store %arg8[%c0_20, %c0_21], %48 {strides = array<i32>} : memref<40x256xf32, #tpu.memory_space<vmem>>, vector<40x256xf32>,
    %c0_22 = arith.constant 0 : index
    %c0_23 = arith.constant 0 : index
    %50 = vector.load %arg4[%c0_22, %c0_23] : memref<256x512xf32, #tpu.memory_space<vmem>>, vector<256x512xf32>
    %cst_24 = arith.constant dense<0.000000e+00> : vector<40x512xf32>
    %51 = tpu.matmul %32, %50, %cst_24 {dimension_numbers = #tpu.dot_dimension_numbers<[1], [0], [0], [1], [0, 0, 1, 1], [], []>} : vector<40x256xf32>, vector<256x512xf32>, vector<40x512xf32> -> vector<40x512xf32>
    %c5 = arith.constant 5 : index
    %c0_25 = arith.constant 0 : index
    %52 = vector.load %arg6[%c5, %c0_25] : memref<16x512xf32, #tpu.memory_space<vmem>>, vector<1x512xf32>
    %53 = vector.broadcast %52 : vector<1x512xf32> to vector<40x512xf32>
    %54 = arith.addf %51, %53 : vector<40x512xf32>
    %cst_26 = arith.constant 0.000000e+00 : f32
    %55 = vector.broadcast %cst_26 : f32 to vector<40x512xf32>
    %56 = arith.maximumf %54, %55 : vector<40x512xf32>
    %57 = math.absf %54 : vector<40x512xf32>
    %cst_27 = arith.constant 0.000000e+00 : f32
    %58 = vector.broadcast %cst_27 : f32 to vector<40x512xf32>
    %59 = arith.subf %58, %57 : vector<40x512xf32>
    %60 = math.exp %59 : vector<40x512xf32>
    %cst_28 = arith.constant 1.000000e+00 : f32
    %61 = vector.broadcast %cst_28 : f32 to vector<40x512xf32>
    %62 = arith.addf %61, %60 : vector<40x512xf32>
    %63 = math.log %62 : vector<40x512xf32>
    %64 = arith.addf %56, %63 : vector<40x512xf32>
    %c6 = arith.constant 6 : index
    %c0_29 = arith.constant 0 : index
    %65 = vector.load %arg6[%c6, %c0_29] : memref<16x512xf32, #tpu.memory_space<vmem>>, vector<1x512xf32>
    %66 = vector.broadcast %65 : vector<1x512xf32> to vector<40x512xf32>
    %67 = arith.mulf %64, %66 : vector<40x512xf32>
    %c7 = arith.constant 7 : index
    %c0_30 = arith.constant 0 : index
    %68 = vector.load %arg6[%c7, %c0_30] : memref<16x512xf32, #tpu.memory_space<vmem>>, vector<1x512xf32>
    %69 = vector.broadcast %68 : vector<1x512xf32> to vector<40x512xf32>
    %70 = arith.addf %67, %69 : vector<40x512xf32>
    %cst_31 = arith.constant 0.000000e+00 : f32
    %71 = vector.broadcast %cst_31 : f32 to vector<40x512xf32>
    %72 = arith.maximumf %70, %71 : vector<40x512xf32>
    %73 = math.absf %70 : vector<40x512xf32>
    %cst_32 = arith.constant 0.000000e+00 : f32
    %74 = vector.broadcast %cst_32 : f32 to vector<40x512xf32>
    %75 = arith.subf %74, %73 : vector<40x512xf32>
    %76 = math.exp %75 : vector<40x512xf32>
    %cst_33 = arith.constant 1.000000e+00 : f32
    %77 = vector.broadcast %cst_33 : f32 to vector<40x512xf32>
    %78 = arith.addf %77, %76 : vector<40x512xf32>
    %79 = math.log %78 : vector<40x512xf32>
    %80 = arith.addf %72, %79 : vector<40x512xf32>
    %c0_34 = arith.constant 0 : index
    %c0_35 = arith.constant 0 : index
    %81 = vector.load %arg9[%c0_34, %c0_35] : memref<40x512xf32, #tpu.memory_space<vmem>>, vector<40x512xf32>
    tpu.vector_store %arg9[%c0_34, %c0_35], %80 {strides = array<i32>} : memref<40x512xf32, #tpu.memory_space<vmem>>, vector<40x512xf32>,
    %c0_36 = arith.constant 0 : index
    %c0_37 = arith.constant 0 : index
    %82 = vector.load %arg2[%c0_36, %c0_37] : memref<40x80xf32, #tpu.memory_space<vmem>>, vector<40x80xf32>
    %c0_38 = arith.constant 0 : index
    %c0_39 = arith.constant 0 : index
    %83 = vector.load %arg5[%c0_38, %c0_39] : memref<80x256xf32, #tpu.memory_space<vmem>>, vector<80x256xf32>
    %cst_40 = arith.constant dense<0.000000e+00> : vector<40x256xf32>
    %84 = tpu.matmul %82, %83, %cst_40 {dimension_numbers = #tpu.dot_dimension_numbers<[1], [0], [0], [1], [0, 0, 1, 1], [], []>} : vector<40x80xf32>, vector<80x256xf32>, vector<40x256xf32> -> vector<40x256xf32>
    %c8 = arith.constant 8 : index
    %c0_41 = arith.constant 0 : index
    %85 = vector.load %arg6[%c8, %c0_41] : memref<16x512xf32, #tpu.memory_space<vmem>>, vector<1x256xf32>
    %86 = vector.broadcast %85 : vector<1x256xf32> to vector<40x256xf32>
    %87 = arith.addf %84, %86 : vector<40x256xf32>
    %88 = vector.extract_strided_slice %87 {offsets = [0, 0], sizes = [40, 128], strides = [1, 1]} : vector<40x256xf32> to vector<40x128xf32>
    %c0_42 = arith.constant 0 : index
    %c0_43 = arith.constant 0 : index
    %89 = vector.load %arg10[%c0_42, %c0_43] : memref<40x256xf32, #tpu.memory_space<vmem>>, vector<40x128xf32>
    tpu.vector_store %arg10[%c0_42, %c0_43], %88 {strides = array<i32>} : memref<40x256xf32, #tpu.memory_space<vmem>>, vector<40x128xf32>,
    %90 = vector.extract_strided_slice %87 {offsets = [0, 128], sizes = [40, 128], strides = [1, 1]} : vector<40x256xf32> to vector<40x128xf32>
    %91 = math.exp %90 : vector<40x128xf32>
    %c0_44 = arith.constant 0 : index
    %c128 = arith.constant 128 : index
    %92 = vector.load %arg10[%c0_44, %c128] : memref<40x256xf32, #tpu.memory_space<vmem>>, vector<40x128xf32>
    tpu.vector_store %arg10[%c0_44, %c128], %91 {strides = array<i32>} : memref<40x256xf32, #tpu.memory_space<vmem>>, vector<40x128xf32>,
    return
  }
  func.func @transform_0(%arg0: i32) -> (i32, i32) {
    %c0_i32 = arith.constant 0 : i32
    %c0_i32_0 = arith.constant 0 : i32
    return %arg0, %c0_i32 : i32, i32
  }
  func.func @transform_1(%arg0: i32) -> (i32, i32) {
    %c0_i32 = arith.constant 0 : i32
    %c0_i32_0 = arith.constant 0 : i32
    return %arg0, %c0_i32 : i32, i32
  }
  func.func @transform_2(%arg0: i32) -> (i32, i32) {
    %c0_i32 = arith.constant 0 : i32
    %c0_i32_0 = arith.constant 0 : i32
    %c0_i32_1 = arith.constant 0 : i32
    return %c0_i32, %c0_i32_0 : i32, i32
  }
  func.func @transform_3(%arg0: i32) -> (i32, i32) {
    %c0_i32 = arith.constant 0 : i32
    %c0_i32_0 = arith.constant 0 : i32
    %c0_i32_1 = arith.constant 0 : i32
    return %c0_i32, %c0_i32_0 : i32, i32
  }
  func.func @transform_4(%arg0: i32) -> (i32, i32) {
    %c0_i32 = arith.constant 0 : i32
    %c0_i32_0 = arith.constant 0 : i32
    %c0_i32_1 = arith.constant 0 : i32
    return %c0_i32, %c0_i32_0 : i32, i32
  }
  func.func @transform_5(%arg0: i32) -> (i32, i32) {
    %c0_i32 = arith.constant 0 : i32
    %c0_i32_0 = arith.constant 0 : i32
    %c0_i32_1 = arith.constant 0 : i32
    return %c0_i32, %c0_i32_0 : i32, i32
  }
  func.func @transform_6(%arg0: i32) -> (i32, i32) {
    %c0_i32 = arith.constant 0 : i32
    %c0_i32_0 = arith.constant 0 : i32
    return %arg0, %c0_i32 : i32, i32
  }
  func.func @transform_7(%arg0: i32) -> (i32, i32) {
    %c0_i32 = arith.constant 0 : i32
    %c0_i32_0 = arith.constant 0 : i32
    return %arg0, %c0_i32 : i32, i32
  }
  func.func @transform_8(%arg0: i32) -> (i32, i32) {
    %c0_i32 = arith.constant 0 : i32
    %c0_i32_0 = arith.constant 0 : i32
    return %arg0, %c0_i32 : i32, i32
  }
  func.func @transform_9(%arg0: i32) -> (i32, i32) {
    %c0_i32 = arith.constant 0 : i32
    %c0_i32_0 = arith.constant 0 : i32
    return %arg0, %c0_i32 : i32, i32
  }
}

</mosaic_0001>

<bundles_post_ra>
// kernel: tpu_custom_call.1
= control target key start
LH: loop header
LB: loop body
LE: loop exit
PB: predicated region body
PF: predicated region fallthrough
CT: control target
= control target key end

     0   :  { %s4026_s0 = inlined_call_operand.hbm [shape: f32[80,128], index: 0, kind: input, shape index: {}]   ;;  %s4027_s1 = inlined_call_operand.hbm [shape: f32[80,80], index: 1, kind: input, shape index: {}]   ;;  %s4028_s2 = inlined_call_operand.hbm [shape: f32[128,256], index: 2, kind: input, shape index: {}]   ;;  %s4029_s3 = inlined_call_operand.hbm [shape: f32[256,512], index: 3, kind: input, shape index: {}]   ;;  %s4030_s4 = inlined_call_operand.hbm [shape: f32[80,256], index: 4, kind: input, shape index: {}]   ;;  %s4031_s5 = inlined_call_operand.hbm [shape: f32[16,512], index: 5, kind: input, shape index: {}]   ;;  %s4032_s6 = inlined_call_operand.hbm [shape: f32[80,128], index: 6, kind: output, shape index: {0}]   ;;  %s4033_s7 = inlined_call_operand.hbm [shape: f32[80,256], index: 7, kind: output, shape index: {1}]   ;;  %s4034_s8 = inlined_call_operand.hbm [shape: f32[80,512], index: 8, kind: output, shape index: {2}]   ;;  %s4035_s9 = inlined_call_operand.hbm [shape: f32[80,256], index: 9, kind: output, shape index: {3}]  }
   0x1   :  { %4041 = sst [smem:[#allocation28_spill]] %s4026_s0 }
   0x2   :  { %4042 = sst [smem:[#allocation29_spill]] %s4028_s2 }
   0x3   :  { %4043 = sst [smem:[#allocation30_spill]] %s4029_s3 }
   0x4   :  { %4044 = sst [smem:[#allocation31_spill]] %s4030_s4 }
   0x5   :  { %4045 = sst [smem:[#allocation32_spill]] %s4031_s5 }
   0x6   :  { %15 = vsyncpa [#allocation3], 0 }
   0x7   :  { %17 = vsyncpa [#allocation3 + $0x1], 0 }
   0x8   :  { %18 = vsyncpa [#allocation6], 0 }
   0x9   :  { %20 = vsyncpa [#allocation6 + $0x1], 0 }
   0xa   :  { %21 = vsyncpa [#allocation9], 0 }
   0xb   :  { %22 = vsyncpa [#allocation12], 0 }
   0xc   :  { %23 = vsyncpa [#allocation4], 0 }
   0xd   :  { %25 = vsyncpa [#allocation4 + $0x1], 0 }
   0xe   :  { %26 = vsyncpa [#allocation15], 0 }
   0xf   :  { %28 = vsyncpa [#allocation15 + $0x1], 0 }
  0x10   :  { %29 = vsyncpa [#allocation18], 0 }
  0x11   :  { %31 = vsyncpa [#allocation18 + $0x1], 0  ;;  %s3045_s30 = smov 0   ;;  %s3047_s10 = smov 0  }
  0x12   :  { %s3049_s11 = smov 0   ;;  %s3051_s12 = smov 0  }
  0x13 LB: > { %s3066_s13 = sadd.s32 4294967295, %s2970_s12   ;;  %s4036_s14 = sadd.s32 4294967294, %s2970_s12   ;;  %s2970_s12 = sphi %s3051_s12, %s4083_s12   ;;  %s2966_s11 = sphi %s3049_s11, %s4082_s11   ;;  %s2962_s10 = sphi %s3047_s10, %s4081_s10   ;;  %s2958_s30 = sphi %s3045_s30, %s4080_s30  }
  0x14   : > { %p57_p0 = scmp.ne.s32.totalorder %s2962_s10, %s2958_s30  ;;  %p4037_p1 = scmp.eq.s32.totalorder %s3066_s13, 0 }
  0x15   : > { %p197_p3 = scmp.eq.s32.totalorder %s4036_s14, 1  ;;  %p2210_p5 = scmp.ge.s32.totalorder %s2970_s12, 1 }
  0x16   : > { %p3077_p4 = por %p4037_p1, %p57_p0  ;;  %p282_p7 = scmp.lt.s32.totalorder %s2970_s12, 3 }
  0x17   : > { %p3082_p6 = por %p197_p3, %p57_p0  ;;  %s2972_s18 = smov [#allocation7]  }
  0x18   : > { %s4046_s15 = scalar_select %p3077_p4, 1, 0 }
  0x19   : > { %s4047_s16 = scalar_select %p3082_p6, 1, 0 }
  0x1a   : > { %p3087_p8 = pnand %p2210_p5, %p282_p7  ;;  %s294_s19 = sshll.u32 %s2972_s18, 4  ;;  %s295_s19 = int_to_ptr.vmem [resolvable:$true] %s294_s19 }
  0x1b   : > { %s2973_s21 = smov [#allocation8]   ;;  %s2655_s23 = scalar_lea.vmem %s295_s19, 4096 }
  0x1c   : > { %p2282_p9 = pneg %p3087_p8  ;;  %s307_s22 = sshll.u32 %s2973_s21, 4  ;;  %s308_s22 = int_to_ptr.vmem [resolvable:$true] %s307_s22 }
  0x1d   : > { %p2656_p13 = scmp.ne.s32.totalorder %s295_s19, %s2655_s23  ;;  %p2663_p5 = scmp.lt.s32.totalorder %s295_s19, %s295_s19 }
  0x1e   : > { %p3096_p11 = pnand %p2282_p9, %p4037_p1  ;;  %p2664_p7 = scmp.lt.s32.totalorder %s2655_s23, %s2655_s23 }
  0x20   : > { %p2646_p12 = pneg %p3096_p11  ;;  %p2665_p10 = por %p2664_p7, %p2663_p5 }
  0x22   : > { %p2658_p0 = pnand %p2656_p13, %p2646_p12 }
  0x24   : > { %p2659_p3 = pneg %p2658_p0 }
  0x26   : > { %p2666_p9 = pnand %p2665_p10, %p2659_p3 }
  0x28   : > { %2669 = shalt.err (!%p2666_p9)
}
  0x29   : > { %s2974_s24 = smov 256   ;;  %s2975_s25 = smov 16  }
  0x2a   : > { %s4050_s2 = sld [smem:[#allocation29_spill]]  ;;  %s2681_s28 = scalar_lea.vmem %s308_s22, 16384 }
  0x2b   : > { %p2682_p13 = scmp.ne.s32.totalorder %s308_s22, %s2681_s28  ;;  %p2689_p10 = scmp.lt.s32.totalorder %s308_s22, %s308_s22 }
  0x2c   : > { %p2690_p3 = scmp.lt.s32.totalorder %s2681_s28, %s2681_s28 }
  0x2d   : > { %p2684_p0 = pnand %p2682_p13, %p2646_p12 }
  0x2e   : > { %p2691_p7 = por %p2690_p3, %p2689_p10 }
  0x2f   : > { %p2685_p5 = pneg %p2684_p0 }
  0x30   : > { %2285 = dma.hbm_to_vmem [thread:$0]  (!%p3096_p11), %s4050_s2, 4096, %s295_s19, [#allocation6], %s2974_s24, %s2974_s24, %s2975_s25  }
  0x31   : > { %p2692_p9 = pnand %p2691_p7, %p2685_p5 }
  0x33   : > { %2695 = shalt.err (!%p2692_p9)
}
  0x34   : > { %s2976_s29 = smov 512   ;;  %s2977_s18 = smov 32  }
  0x35   : > { %s4051_s3 = sld [smem:[#allocation30_spill]]  ;;  %s2978_s23 = smov [#allocation10]  }
  0x36   : > { %s320_s26 = sshll.u32 %s2978_s23, 4  ;;  %s2979_s27 = smov [#allocation11]   ;;  %s321_s26 = int_to_ptr.vmem [resolvable:$true] %s320_s26 }
  0x37   : > { %s333_s14 = sshll.u32 %s2979_s27, 4  ;;  %s2707_s28 = scalar_lea.vmem %s321_s26, 2560  ;;  %s334_s14 = int_to_ptr.vmem [resolvable:$true] %s333_s14 }
  0x38   : > { %p2708_p13 = scmp.ne.s32.totalorder %s321_s26, %s2707_s28  ;;  %p2715_p10 = scmp.lt.s32.totalorder %s321_s26, %s321_s26 }
  0x39   : > { %p2716_p3 = scmp.lt.s32.totalorder %s2707_s28, %s2707_s28 }
  0x3a   : > { %p2710_p0 = pnand %p2708_p13, %p2646_p12 }
  0x3b   : > { %2288 = dma.hbm_to_vmem [thread:$0]  (!%p3096_p11), %s4051_s3, 16384, %s308_s22, [#allocation9], %s2976_s29, %s2976_s29, %s2977_s18  }
  0x3c   : > { %p2711_p5 = pneg %p2710_p0  ;;  %p2717_p7 = por %p2716_p3, %p2715_p10 }
  0x3e   : > { %p2718_p9 = pnand %p2717_p7, %p2711_p5 }
  0x40   : > { %2721 = shalt.err (!%p2718_p9)
}
  0x41   : > { %s4052_s4 = sld [smem:[#allocation31_spill]]  ;;  %s2733_s21 = scalar_lea.vmem %s334_s14, 1024 }
  0x42   : > { %p2734_p1 = scmp.ne.s32.totalorder %s334_s14, %s2733_s21  ;;  %p2741_p2 = scmp.lt.s32.totalorder %s334_s14, %s334_s14 }
  0x43   : > { %p2742_p10 = scmp.lt.s32.totalorder %s2733_s21, %s2733_s21 }
  0x44   : > { %p2736_p13 = pnand %p2734_p1, %p2646_p12 }
  0x45   : > { %p2743_p5 = por %p2742_p10, %p2741_p2 }
  0x46   : > { %p2737_p0 = pneg %p2736_p13 }
  0x47   : > { %2291 = dma.hbm_to_vmem [thread:$0]  (!%p3096_p11), %s4052_s4, 2560, %s321_s26, [#allocation9], %s2974_s24, %s2974_s24, %s2975_s25  }
  0x48   : > { %p2744_p3 = pnand %p2743_p5, %p2737_p0 }
  0x4a   : > { %2747 = shalt.err (!%p2744_p3)
}
  0x4b   : > { %s4053_s5 = sld [smem:[#allocation32_spill]]  ;;  %s3147_s20 = sadd.s32 1, %s2970_s12  }
  0x4c   : > { %s41_s24 = ssub.s32 %s2970_s12, %s3147_s20  ;;  %s44_s25 = sadd.s32 1, %s2966_s11 }
  0x4d   : > { %p42_p1 = scmp.eq.s32.totalorder %s41_s24, 0  ;;  %p51_p2 = scmp.ne.s32.totalorder %s2966_s11, %s2962_s10 }
  0x4e   : > { %p52_p12 = scmp.eq.s32.totalorder %s2970_s12, 0  ;;  %p4055_p9 = scmp.eq.s32.totalorder %s3066_s13, 1 }
  0x4f   : > { %s3156_s26 = scalar_select %p42_p1, %s2966_s11, %s44_s25  }
  0x50   : > { %p53_p7 = por %p52_p12, %p51_p2  ;;  %p3160_p13 = por %p4055_p9, %p51_p2 }
  0x51   : > { %2294 = dma.hbm_to_vmem [thread:$0]  (!%p3096_p11), %s4053_s5, 1024, %s334_s14, [#allocation12], %s2976_s29, %s2976_s29, %s2977_s18  }
  0x52   : > { %4054 = sst [smem:[#allocation27_spill]] %s3156_s26  ;;  %p2319_p0 = scmp.lt.s32.totalorder %s2970_s12, 2 }
  0x53   : > { %s4056_s28 = scalar_select %p3160_p13, 1, 0 }
  0x54   : > { %s347_s22 = sand.u32 1, %s2966_s11   ;;  %s4038_s29 = smul.u32 640, %s2970_s12 }
  0x55   : > { %s3166_s14 = smul.u32 40, %s347_s22  ;;  %p3169_p11 = pnand %p2319_p0, %p53_p7 }
  0x56   : > { %s4058_s0 = sld [smem:[#allocation28_spill]]  ;;  %s368_s25 = sand.u32 1, %s2970_s12  }
  0x57   : > { %s351_s27 = scalar_lea.vmem [#allocation2], %s3166_s14  ;;  %s3184_s2 = scalar_lea.sflag [#allocation3], %s347_s22 }
  0x58   : > { %s358_s24 = sshll.u32 %s351_s27, 4  ;;  %p2750_p5 = pneg %p3169_p11  ;;  %s3181_s24 = int_to_ptr.vmem [resolvable:$true] %s358_s24 }
  0x5c   : > { %s3178_s23 = scalar_lea.hbm %s4058_s0, %s4038_s29  ;;  %s2753_s29 = scalar_lea.hbm %s4058_s0, 1280 }
  0x5d   : > { %s2748_s3 = scalar_lea.hbm %s3178_s23, 640  ;;  %p2754_p2 = scmp.lt.s32.totalorder %s3178_s23, %s4058_s0 }
  0x5e   : > { %p2749_p10 = scmp.ne.s32.totalorder %s3178_s23, %s2748_s3  ;;  %p2755_p12 = scmp.lt.s32.totalorder %s2753_s29, %s2748_s3 }
  0x60   : > { %p2751_p3 = pnand %p2750_p5, %p2749_p10  ;;  %p2756_p7 = por %p2755_p12, %p2754_p2 }
  0x62   : > { %p2752_p1 = pneg %p2751_p3 }
  0x64   : > { %p2757_p9 = pnand %p2756_p7, %p2752_p1 }
  0x66   : > { %2760 = shalt.err (!%p2757_p9)
}
  0x67   : > { %s2761_s22 = scalar_lea.vmem %s3181_s24, 640  ;;  %s2980_s27 = smov [#allocation2]  }
  0x68   : > { %p2762_p0 = scmp.ne.s32.totalorder %s3181_s24, %s2761_s22  ;;  %s2766_s19 = sshll.u32 %s2980_s27, 4  ;;  %s2767_s19 = int_to_ptr.vmem [resolvable:$false] %s2766_s19 }
  0x69   : > { %s2768_s21 = scalar_lea.vmem %s2767_s19, 1280  ;;  %p2769_p6 = scmp.lt.s32.totalorder %s3181_s24, %s2767_s19 }
  0x6a   : > { %p2764_p10 = pnand %p2762_p0, %p2750_p5  ;;  %p2770_p13 = scmp.lt.s32.totalorder %s2768_s21, %s2761_s22 }
  0x6c   : > { %p2765_p3 = pneg %p2764_p10  ;;  %p2771_p4 = por %p2770_p13, %p2769_p6 }
  0x6e   : > { %p2772_p2 = pnand %p2771_p4, %p2765_p3 }
  0x70   : > { %2775 = shalt.err (!%p2772_p2)
}
  0x71   : > { %s2981_s3 = smov 128   ;;  %s2982_s4 = smov 8  }
  0x72   : > { %2298 = dma.hbm_to_vmem [thread:$0]  (!%p3169_p11), %s3178_s23, 640, %s3181_s24, %s3184_s2, %s2981_s3, %s2981_s3, %s2982_s4  }
  0x73   : > { %s4059_s5 = smul.u32 640, %s2970_s12  ;;  %s372_s19 = scalar_lea.vmem [#allocation5], %s3166_s14 }
  0x74   : > { %s379_s21 = sshll.u32 %s372_s19, 4  ;;  %s369_s0 = scalar_lea.sflag [#allocation6], %s368_s25  ;;  %s3222_s21 = int_to_ptr.vmem [resolvable:$true] %s379_s21 }
  0x75   : > { %s3219_s27 = scalar_lea.hbm %s4027_s1, %s4059_s5  ;;  %s2781_s24 = scalar_lea.hbm %s4027_s1, 1280 }
  0x76   : > { %s2776_s26 = scalar_lea.hbm %s3219_s27, 640  ;;  %p2782_p1 = scmp.lt.s32.totalorder %s3219_s27, %s4027_s1 }
  0x77   : > { %p2777_p4 = scmp.ne.s32.totalorder %s3219_s27, %s2776_s26  ;;  %p2783_p12 = scmp.lt.s32.totalorder %s2781_s24, %s2776_s26 }
  0x79   : > { %p2779_p6 = pnand %p2777_p4, %p2750_p5  ;;  %p2784_p7 = por %p2783_p12, %p2782_p1 }
  0x7b   : > { %p2780_p13 = pneg %p2779_p6 }
  0x7d   : > { %p2785_p9 = pnand %p2784_p7, %p2780_p13 }
  0x7f   : > { %2788 = shalt.err (!%p2785_p9)
}
  0x80   : > { %s2789_s14 = scalar_lea.vmem %s3222_s21, 640  ;;  %s2983_s25 = smov [#allocation5]  }
  0x81   : > { %p2790_p0 = scmp.ne.s32.totalorder %s3222_s21, %s2789_s14  ;;  %s2794_s22 = sshll.u32 %s2983_s25, 4  ;;  %s2795_s22 = int_to_ptr.vmem [resolvable:$false] %s2794_s22 }
  0x82   : > { %s2796_s19 = scalar_lea.vmem %s2795_s22, 1280  ;;  %p2797_p2 = scmp.lt.s32.totalorder %s3222_s21, %s2795_s22 }
  0x83   : > { %p2792_p10 = pnand %p2790_p0, %p2750_p5  ;;  %p2798_p4 = scmp.lt.s32.totalorder %s2796_s19, %s2789_s14 }
  0x85   : > { %p2793_p3 = pneg %p2792_p10  ;;  %p2799_p6 = por %p2798_p4, %p2797_p2 }
  0x87   : > { %p2800_p1 = pnand %p2799_p6, %p2793_p3 }
  0x89   : > { %2803 = shalt.err (!%p2800_p1)
}
  0x8a   : > { %2301 = dma.hbm_to_vmem [thread:$0]  (!%p3169_p11), %s3219_s27, 640, %s3222_s21, %s369_s0, %s2981_s3, %s2981_s3, %s2982_s4  }
  0x8b   : > { %391 = sbr.rel (%p3087_p8) target bundleno = 834 (0x342), region = 44  ;;  %s3254_s26 = sand.u32 (!%p3087_p8), 1, %s2962_s10  }
  0x8c   : > { %s3257_s2 = smul.u32 (!%p3087_p8), 40, %s3254_s26  ;;  %s394_s23 = scalar_lea.sflag (!%p3087_p8), [#allocation3], %s3254_s26 }
  0x8d   : > { %p4060_p5 = scmp.ne.s32.totalorder (!%p3087_p8), %s4046_s15, 0 }
  0x8e   : > { %s3261_s18 = scalar_lea.vmem (!%p3087_p8), [#allocation2], %s3257_s2 }
  0x90   : > { %2925 = dma.done.wait (%p4060_p5), %s394_s23, 640  }
  0x91   : > { %2927 = vsyncadd (%p4060_p5), %s394_s23, 4294966656  ;;  %s402_s0 = sand.u32 1, %s3066_s13   ;;  %s3271_s3 = scalar_lea.vmem [#allocation5], %s3257_s2 }
  0x92   : > { %s403_s17 = scalar_lea.sflag [#allocation6], %s402_s0 }
  0x93   : > { %2929 = dma.done.wait (%p4060_p5), %s403_s17, 640  }
  0x94   : > { %2931 = vsyncadd (%p4060_p5), %s403_s17, 4294966656  ;;  %p4061_p8 = scmp.eq.s32.totalorder %s3066_s13, 0 }
  0x96   : > { %2933 = dma.done.wait (%p4061_p8), [#allocation6], 4096   ;;  %p4062_p11 = pmov %p4061_p8 }
  0x97   : > { %p4063_p13 = pmov %p4061_p8 }
  0x98   : > { %2935 = vsyncadd (%p4062_p11), [#allocation6], 4294963200 }
  0x99   : > { %2937 = dma.done.wait (%p4063_p13), [#allocation9], 18944   ;;  %p4064_p12 = pmov %p4061_p8 }
  0x9a   : > { %p4065_p7 = pmov %p4061_p8 }
  0x9b   : > { %2939 = vsyncadd (%p4064_p12), [#allocation9], 4294948352 }
  0x9c   : > { %2941 = dma.done.wait (%p4065_p7), [#allocation12], 1024   ;;  %p4066_p9 = pmov %p4065_p7 }
  0x9d   : > { %v2984_v0 = vmov 0.0   ;;  %v581_v1 = vld [vmem:[#allocation7 + $0xf8] sm:$0xff]  ;;  %v580_v2 = vld [vmem:[#allocation7 + $0xf0] sm:$0xff]  ;;  %v579_v3 = vld [vmem:[#allocation7 + $0xe8] sm:$0xff]  ;;  %s3340_s15 = scalar_lea.vmem [#allocation13], %s3257_s2  ;;  %vm1771_vm0 = vcmask 654336  }
  0x9e   : > { %2943 = vsyncadd (%p4066_p9), [#allocation12], 4294966272  ;;  %659 = vmatprep.mubr.f32.mxu0 %v2984_v0  ;;  %595 = vmatprep.subr.mxu0 %v581_v1  ;;  %v578_v4 = vld [vmem:[#allocation7 + $0xe0] sm:$0xff]  ;;  %v577_v5 = vld [vmem:[#allocation7 + $0xd8] sm:$0xff]  ;;  %s2252_s4 = smul.u32 80, %s3254_s26  ;;  %s3648_s23 = scalar_lea.sflag [#allocation15], %s402_s0 }
  0x9f   : > { %596 = vmatpush1.msra.mxu0 %v580_v2  ;;  %v576_v6 = vld [vmem:[#allocation7 + $0xd0] sm:$0xff]  ;;  %v575_v7 = vld [vmem:[#allocation7 + $0xc8] sm:$0xff]  ;;  %v574_v8 = vld [vmem:[#allocation7 + $0xc0] sm:$0xff]  ;;  %s2246_s21 = smul.u32 1280, %s3066_s13  ;;  %p4067_p10 = scmp.ne.s32.totalorder %s4056_s28, 0 }
  0xa0   : > { %597 = vmatprep.subr.mxu0 %v579_v3  ;;  %v573_v9 = vld [vmem:[#allocation7 + $0xb8] sm:$0xff]  ;;  %v572_v10 = vld [vmem:[#allocation7 + $0xb0] sm:$0xff]  ;;  %v571_v11 = vld [vmem:[#allocation7 + $0xa8] sm:$0xff]  ;;  %s3476_s27 = scalar_lea.vmem [#allocation14], %s2252_s4  ;;  %s2239_s5 = smul.u32 640, %s3066_s13 }
  0xa1   : > { %598 = vmatpush1.msra.mxu0 %v578_v4  ;;  %v570_v12 = vld [vmem:[#allocation7 + $0xa0] sm:$0xff]  ;;  %v569_v13 = vld [vmem:[#allocation7 + $0x98] sm:$0xff]  ;;  %v568_v14 = vld [vmem:[#allocation7 + $0x90] sm:$0xff]  ;;  %s1948_s24 = sshll.u32 %s3476_s27, 4  ;;  %s3627_s25 = scalar_lea.hbm %s4033_s7, %s2246_s21  ;;  %s3631_s24 = int_to_ptr.vmem [resolvable:$true] %s1948_s24 }
  0xa2   : > { %599 = vmatprep.subr.mxu0 %v577_v5  ;;  %v567_v15 = vld [vmem:[#allocation7 + $0x88] sm:$0xff]  ;;  %v488_v17 = vld [vmem:[#allocation11] ss:$0 sm:$0xff]  ;;  %v494_v18 = vld [vmem:[#allocation11 + $0x1] ss:$0 sm:$0xff]  ;;  %s3639_s2 = scalar_lea.hbm %s4032_s6, %s2239_s5  ;;  %s2985_s17 = smov [#allocation14]  }
  0xa3   : > { %600 = vmatpush1.msra.mxu0 %v576_v6  ;;  %v3291_v16 = vld [vmem:[%s3261_s18] sm:$0xff]  ;;  %v3294_v19 = vld [vmem:[%s3261_s18 + $0x8] sm:$0xff]  ;;  %v3299_v22 = vld [vmem:[%s3261_s18 + $0x10] sm:$0xff] }
  0xa4   : > { %601 = vmatprep.subr.mxu0 %v575_v7  ;;  %v489_v20 = vmul.f32 %v488_v17, %v3291_v16  ;;  %v490_v21 = vmul.f32 %v488_v17, %v3294_v19  ;;  %v3302_v23 = vld [vmem:[%s3261_s18 + $0x18] sm:$0xff]  ;;  %v3305_v24 = vld [vmem:[%s3261_s18 + $0x20] sm:$0xff]  ;;  %v491_v26 = vmul.f32 %v488_v17, %v3299_v22  ;;  %v564_v35 = vld [vmem:[#allocation7 + $0x70] sm:$0xff]  ;;  %s2804_s18 = scalar_lea.vmem %s3631_s24, 1280 }
  0xa5   : > { %602 = vmatpush1.msra.mxu0 %v574_v8  ;;  %v566_v25 = vld [vmem:[#allocation7 + $0x80] sm:$0xff]  ;;  %v492_v27 = vmul.f32 %v488_v17, %v3302_v23  ;;  %v493_v28 = vmul.f32 %v488_v17, %v3305_v24  ;;  %v987_v29 = vld [vmem:[#allocation8 + $0x1e8] sm:$0xff]  ;;  %v565_v31 = vld [vmem:[#allocation7 + $0x78] sm:$0xff]  ;;  %p2805_p0 = scmp.ne.s32.totalorder %s3631_s24, %s2804_s18 }
  0xa6   : > { %603 = vmatprep.subr.mxu0 %v573_v9  ;;  %v986_v30 = vld [vmem:[#allocation8 + $0x1e0] sm:$0xff]  ;;  %v3310_v32 = vadd.f32 %v494_v18, %v489_v20  ;;  %v3312_v33 = vadd.f32 %v494_v18, %v490_v21  ;;  %1077 = vmatprep.subr.mxu1 %v987_v29  ;;  %v983_v34 = vld [vmem:[#allocation8 + $0x1c8] sm:$0xff]  ;;  %v3314_v36 = vadd.f32 %v494_v18, %v491_v26  ;;  %v561_v47 = vld [vmem:[#allocation7 + $0x58] sm:$0xff] }
  0xa7   : > { %604 = vmatpush1.msra.mxu0 %v572_v10  ;;  %v3316_v37 = vadd.f32 %v494_v18, %v492_v27  ;;  %v3318_v38 = vadd.f32 %v494_v18, %v493_v28  ;;  %1078 = vmatpush1.msra.mxu1 %v986_v30  ;;  %v982_v39 = vld [vmem:[#allocation8 + $0x1c0] sm:$0xff]  ;;  %v979_v40 = vld [vmem:[#allocation8 + $0x1a8] sm:$0xff]  ;;  %v560_v51 = vld [vmem:[#allocation7 + $0x50] sm:$0xff]  ;;  %p2806_p3 = pnand %p2805_p0, %p4067_p10 }
  0xa8   : > { %605 = vmatprep.subr.mxu0 %v571_v11  ;;  %v563_v41 = vld [vmem:[#allocation7 + $0x68] sm:$0xff]  ;;  %v505_v42 = vand.u32 2147483647, %v3310_v32  ;;  %v506_v43 = vand.u32 2147483647, %v3312_v33  ;;  %1079 = vmatprep.subr.mxu1 %v983_v34  ;;  %v562_v44 = vld [vmem:[#allocation7 + $0x60] sm:$0xff] }
  0xa9   : > { %606 = vmatpush1.msra.mxu0 %v570_v12  ;;  %v507_v45 = vand.u32 2147483647, %v3314_v36  ;;  %v508_v46 = vand.u32 2147483647, %v3316_v37  ;;  %1080 = vmatpush1.msra.mxu1 %v982_v39  ;;  %v509_v50 = vand.u32 2147483647, %v3318_v38  ;;  %p2807_p2 = pneg %p2806_p3 }
  0xaa   : > { %607 = vmatprep.subr.mxu0 %v569_v13  ;;  %v510_v48 = vsub.f32 0.0, %v505_v42  ;;  %v511_v49 = vsub.f32 0.0, %v506_v43  ;;  %1081 = vmatprep.subr.mxu1 %v979_v40  ;;  %v978_v54 = vld [vmem:[#allocation8 + $0x1a0] sm:$0xff]  ;;  %v975_v55 = vld [vmem:[#allocation8 + $0x188] sm:$0xff]  ;;  %v557_v1 = vld [vmem:[#allocation7 + $0x38] sm:$0xff] }
  0xab   : > { %608 = vmatpush1.msra.mxu0 %v568_v14  ;;  %v512_v52 = vsub.f32 0.0, %v507_v45  ;;  %v513_v53 = vsub.f32 0.0, %v508_v46  ;;  %v559_v56 = vld [vmem:[#allocation7 + $0x48] sm:$0xff]  ;;  %v514_v59 = vsub.f32 0.0, %v509_v50  ;;  %1082 = vmatpush1.msra.mxu1 %v978_v54  ;;  %v558_v60 = vld [vmem:[#allocation7 + $0x40] sm:$0xff]  ;;  %v556_v5 = vld [vmem:[#allocation7 + $0x30] sm:$0xff] }
  0xac   : > { %609 = vmatprep.subr.mxu0 %v567_v15  ;;  %v515_v57 = vmul.f32 1.442695, %v510_v48  ;;  %v517_v58 = vmul.f32 1.442695, %v511_v49  ;;  %1083 = vmatprep.subr.mxu1 %v975_v55  ;;  %v974_v63 = vld [vmem:[#allocation8 + $0x180] sm:$0xff]  ;;  %v971_v3 = vld [vmem:[#allocation8 + $0x168] sm:$0xff] }
  0xad   : > { %610 = vmatpush1.msra.mxu0 %v566_v25  ;;  %v519_v61 = vmul.f32 1.442695, %v512_v52  ;;  %v521_v62 = vmul.f32 1.442695, %v513_v53  ;;  %v523_v2 = vmul.f32 1.442695, %v514_v59  ;;  %1084 = vmatpush1.msra.mxu1 %v974_v63 }
  0xae   : > { %611 = vmatprep.subr.mxu0 %v565_v31  ;;  %2374 = vpow2.f32 %v515_v57  ;;  %v970_v4 = vld [vmem:[#allocation8 + $0x160] sm:$0xff]  ;;  %1085 = vmatprep.subr.mxu1 %v971_v3  ;;  %v967_v6 = vld [vmem:[#allocation8 + $0x148] sm:$0xff]  ;;  %v553_v12 = vld [vmem:[#allocation7 + $0x18] sm:$0xff]  ;;  %v500_v55 = vmax.f32 %v3310_v32, 0.0  ;;  %v501_v57 = vmax.f32 %v3312_v33, 0.0  ;;  %v502_v59 = vmax.f32 %v3314_v36, 0.0 }
  0xaf   : > { %612 = vmatpush1.msra.mxu0 %v564_v35  ;;  %2376 = vpow2.f32 %v517_v58  ;;  %v555_v7 = vld [vmem:[#allocation7 + $0x28] sm:$0xff]  ;;  %1086 = vmatpush1.msra.mxu1 %v970_v4  ;;  %v966_v8 = vld [vmem:[#allocation8 + $0x140] sm:$0xff]  ;;  %v552_v14 = vld [vmem:[#allocation7 + $0x10] sm:$0xff] }
  0xb0   : > { %613 = vmatprep.subr.mxu0 %v563_v41  ;;  %2378 = vpow2.f32 %v519_v61  ;;  %v963_v9 = vld [vmem:[#allocation8 + $0x128] sm:$0xff]  ;;  %v554_v10 = vld [vmem:[#allocation7 + $0x20] sm:$0xff]  ;;  %1087 = vmatprep.subr.mxu1 %v967_v6  ;;  %v989_v25 = vld [vmem:[#allocation8 + $0x1f8] sm:$0xff] }
  0xb1   : > { %614 = vmatpush1.msra.mxu0 %v562_v44  ;;  %2380 = vpow2.f32 %v521_v62  ;;  %v962_v11 = vld [vmem:[#allocation8 + $0x120] sm:$0xff]  ;;  %1088 = vmatpush1.msra.mxu1 %v966_v8  ;;  %v959_v13 = vld [vmem:[#allocation8 + $0x108] sm:$0xff]  ;;  %v988_v26 = vld [vmem:[#allocation8 + $0x1f0] sm:$0xff]  ;;  %v503_v62 = vmax.f32 %v3316_v37, 0.0 }
  0xb2   : > { %615 = vmatprep.subr.mxu0 %v561_v47  ;;  %2382 = vpow2.f32 %v523_v2  ;;  %1089 = vmatprep.subr.mxu1 %v963_v9  ;;  %v958_v15 = vld [vmem:[#allocation8 + $0x100] sm:$0xff]  ;;  %v551_v17 = vld [vmem:[#allocation7 + $0x8] sm:$0xff]  ;;  %v985_v27 = vld [vmem:[#allocation8 + $0x1d8] sm:$0xff] }
  0xb3   : > { %616 = vmatpush1.msra.mxu0 %v560_v51  ;;  %1090 = vmatpush1.msra.mxu1 %v962_v11  ;;  %v955_v18 = vld [vmem:[#allocation8 + $0xe8] sm:$0xff]  ;;  %v550_v20 = vld [vmem:[#allocation7] sm:$0xff]  ;;  %v984_v28 = vld [vmem:[#allocation8 + $0x1d0] sm:$0xff] }
  0xb4   : > { %617 = vmatprep.subr.mxu0 %v559_v56  ;;  %1091 = vmatprep.subr.mxu1 %v959_v13  ;;  %v954_v21 = vld [vmem:[#allocation8 + $0xe0] sm:$0xff]  ;;  %v981_v29 = vld [vmem:[#allocation8 + $0x1b8] sm:$0xff]  ;;  %v980_v31 = vld [vmem:[#allocation8 + $0x1b0] sm:$0xff] }
  0xb5   : > { %618 = vmatpush1.msra.mxu0 %v558_v60  ;;  %1092 = vmatpush1.msra.mxu1 %v958_v15  ;;  %v977_v39 = vld [vmem:[#allocation8 + $0x198] sm:$0xff]  ;;  %v976_v42 = vld [vmem:[#allocation8 + $0x190] sm:$0xff]  ;;  %v947_v9 = vld [vmem:[#allocation8 + $0xa8] sm:$0xff] }
  0xb6   : > { %619 = vmatprep.subr.mxu0 %v557_v1  ;;  %1093 = vmatprep.subr.mxu1 %v955_v18  ;;  %v973_v44 = vld [vmem:[#allocation8 + $0x178] sm:$0xff]  ;;  %v972_v47 = vld [vmem:[#allocation8 + $0x170] sm:$0xff]  ;;  %v946_v11 = vld [vmem:[#allocation8 + $0xa0] sm:$0xff] }
  0xb7   : > { %620 = vmatpush1.msra.mxu0 %v556_v5  ;;  %1094 = vmatpush1.msra.mxu1 %v954_v21  ;;  %v969_v49 = vld [vmem:[#allocation8 + $0x158] sm:$0xff]  ;;  %v964_v51 = vld [vmem:[#allocation8 + $0x130] sm:$0xff]  ;;  %v943_v13 = vld [vmem:[#allocation8 + $0x88] sm:$0xff] }
  0xb8   : > { %621 = vmatprep.subr.mxu0 %v555_v7  ;;  %v965_v50 = vld [vmem:[#allocation8 + $0x138] sm:$0xff]  ;;  %v960_v53 = vld [vmem:[#allocation8 + $0x110] sm:$0xff]  ;;  %v950_v7 = vld [vmem:[#allocation8 + $0xc0] sm:$0xff] }
  0xb9   : > { %622 = vmatpush1.msra.mxu0 %v554_v10  ;;  %v961_v52 = vld [vmem:[#allocation8 + $0x118] sm:$0xff]  ;;  %v956_v54 = vld [vmem:[#allocation8 + $0xf0] sm:$0xff]  ;;  %v942_v15 = vld [vmem:[#allocation8 + $0x80] sm:$0xff] }
  0xba   : > { %623 = vmatprep.subr.mxu0 %v553_v12  ;;  %v953_v6 = vld [vmem:[#allocation8 + $0xd8] sm:$0xff]  ;;  %v952_v8 = vld [vmem:[#allocation8 + $0xd0] sm:$0xff]  ;;  %v939_v18 = vld [vmem:[#allocation8 + $0x68] sm:$0xff] }
  0xbb   : > { %624 = vmatpush1.msra.mxu0 %v552_v14  ;;  %v2375_v30 = vpop.eup %2374  ;;  %v949_v10 = vld [vmem:[#allocation8 + $0xb8] sm:$0xff]  ;;  %v948_v12 = vld [vmem:[#allocation8 + $0xb0] sm:$0xff]  ;;  %v938_v21 = vld [vmem:[#allocation8 + $0x60] sm:$0xff] }
  0xbc   : > { %625 = vmatprep.subr.mxu0 %v551_v17  ;;  %v2377_v34 = vpop.eup %2376  ;;  %v525_v35 = vadd.f32 1.0, %v2375_v30  ;;  %v945_v14 = vld [vmem:[#allocation8 + $0x98] sm:$0xff]  ;;  %v944_v17 = vld [vmem:[#allocation8 + $0x90] sm:$0xff]  ;;  %v931_v30 = vld [vmem:[#allocation8 + $0x28] sm:$0xff] }
  0xbd   : > { %626 = vmatpush1.msra.mxu0 %v550_v20  ;;  %v2379_v40 = vpop.eup %2378  ;;  %v526_v41 = vadd.f32 1.0, %v2377_v34  ;;  %v941_v20 = vld [vmem:[#allocation8 + $0x78] sm:$0xff]  ;;  %v930_v34 = vld [vmem:[#allocation8 + $0x20] sm:$0xff] }
  0xbe   : > { %660 = vmatmul.mubr.f32.vlgmr.msra.gmra.mxu0 %v3291_v16  ;;  %1172 = vmatprep.subr.mxu0 %v989_v25  ;;  %v2381_v16 = vpop.eup %2380  ;;  %2384 = vlog2.f32 %v525_v35  ;;  %v527_v43 = vadd.f32 1.0, %v2379_v40  ;;  %v940_v25 = vld [vmem:[#allocation8 + $0x70] sm:$0xff]  ;;  %v929_v40 = vld [vmem:[#allocation8 + $0x18] sm:$0xff] }
  0xbf   : > { %665 = vmatprep.mubr.f32.mxu0 %v2984_v0  ;;  %1173 = vmatpush1.msra.mxu0 %v988_v26  ;;  %v2383_v45 = vpop.eup %2382  ;;  %2386 = vlog2.f32 %v526_v41  ;;  %v528_v46 = vadd.f32 1.0, %v2381_v16  ;;  %v935_v26 = vld [vmem:[#allocation8 + $0x48] sm:$0xff]  ;;  %v932_v35 = vld [vmem:[#allocation8 + $0x30] sm:$0xff]  ;;  %v926_v41 = vld [vmem:[#allocation8] sm:$0xff] }
  0xc0   : > { %1174 = vmatprep.subr.mxu0 %v985_v27  ;;  %2388 = vlog2.f32 %v527_v43  ;;  %v529_v48 = vadd.f32 1.0, %v2383_v45  ;;  %v937_v27 = vld [vmem:[#allocation8 + $0x58] sm:$0xff]  ;;  %v1051_v16 = vld [vmem:[#allocation8 + $0x3e8] sm:$0xff]  ;;  %v1052_v45 = vld [vmem:[#allocation8 + $0x3f0] sm:$0xff] }
  0xc1   : > { %1175 = vmatpush1.msra.mxu0 %v984_v28  ;;  %2390 = vlog2.f32 %v528_v46  ;;  %v934_v28 = vld [vmem:[#allocation8 + $0x40] sm:$0xff]  ;;  %v1053_v43 = vld [vmem:[#allocation8 + $0x3f8] sm:$0xff]  ;;  %v1047_v46 = vld [vmem:[#allocation8 + $0x3c8] sm:$0xff] }
  0xc2   : > { %666 = vmatmul.mubr.f32.gmra.mxu0 %v3294_v19  ;;  %1176 = vmatprep.subr.mxu0 %v981_v29  ;;  %v968_v19 = vld [vmem:[#allocation8 + $0x150] sm:$0xff]  ;;  %2392 = vlog2.f32 %v529_v48  ;;  %v1046_v48 = vld [vmem:[#allocation8 + $0x3c0] sm:$0xff] }
  0xc3   : > { %671 = vmatprep.mubr.f32.mxu0 %v2984_v0  ;;  %1177 = vmatpush1.msra.mxu0 %v980_v31  ;;  %v936_v29 = vld [vmem:[#allocation8 + $0x50] sm:$0xff]  ;;  %v933_v31 = vld [vmem:[#allocation8 + $0x38] sm:$0xff] }
  0xc4   : > { %1178 = vmatprep.subr.mxu0 %v977_v39  ;;  %v927_v39 = vld [vmem:[#allocation8 + $0x8] sm:$0xff] }
  0xc5   : > { %1179 = vmatpush1.msra.mxu0 %v976_v42  ;;  %v928_v42 = vld [vmem:[#allocation8 + $0x10] sm:$0xff] }
  0xc6   : > { %672 = vmatmul.mubr.f32.gmra.mxu0 %v3299_v22  ;;  %1180 = vmatprep.subr.mxu0 %v973_v44  ;;  %v957_v22 = vld [vmem:[#allocation8 + $0xf8] sm:$0xff]  ;;  %v1050_v44 = vld [vmem:[#allocation8 + $0x3e0] sm:$0xff] }
  0xc7   : > { %677 = vmatprep.mubr.f32.mxu0 %v2984_v0  ;;  %1181 = vmatpush1.msra.mxu0 %v972_v47  ;;  %v1049_v47 = vld [vmem:[#allocation8 + $0x3d8] sm:$0xff] }
  0xc8   : > { %1182 = vmatprep.subr.mxu0 %v969_v49  ;;  %v1048_v49 = vld [vmem:[#allocation8 + $0x3d0] sm:$0xff] }
  0xc9   : > { %1183 = vmatpush1.msra.mxu0 %v968_v19  ;;  %v1043_v19 = vld [vmem:[#allocation8 + $0x3a8] sm:$0xff] }
  0xca   : > { %678 = vmatmul.mubr.f32.gmra.mxu0 %v3302_v23  ;;  %1184 = vmatprep.subr.mxu0 %v965_v50  ;;  %v1045_v50 = vld [vmem:[#allocation8 + $0x3b8] sm:$0xff] }
  0xcb   : > { %683 = vmatprep.mubr.f32.mxu0 %v2984_v0  ;;  %1185 = vmatpush1.msra.mxu0 %v964_v51  ;;  %v2385_v56 = vpop.eup %2384  ;;  %v1042_v51 = vld [vmem:[#allocation8 + $0x3a0] sm:$0xff] }
  0xcc   : > { %1186 = vmatprep.subr.mxu0 %v961_v52  ;;  %v2387_v23 = vpop.eup %2386  ;;  %v531_v58 = vmul.f32 0.6931472, %v2385_v56  ;;  %v1044_v52 = vld [vmem:[#allocation8 + $0x3b0] sm:$0xff]  ;;  %v1035_v56 = vld [vmem:[#allocation8 + $0x368] sm:$0xff] }
  0xcd   : > { %1187 = vmatpush1.msra.mxu0 %v960_v53  ;;  %v2389_v60 = vpop.eup %2388  ;;  %v533_v61 = vmul.f32 0.6931472, %v2387_v23  ;;  %v1039_v53 = vld [vmem:[#allocation8 + $0x388] sm:$0xff]  ;;  %v1034_v23 = vld [vmem:[#allocation8 + $0x360] sm:$0xff] }
  0xce   : > { %684 = vmatmul.mubr.f32.gmra.mxu0 %v3305_v24  ;;  %1188 = vmatprep.subr.mxu0 %v957_v22  ;;  %v2391_v63 = vpop.eup %2390  ;;  %v540_v1 = vadd.f32 %v531_v58, %v500_v55  ;;  %v535_v2 = vmul.f32 0.6931472, %v2389_v60  ;;  %v504_v24 = vmax.f32 %v3318_v38, 0.0  ;;  %v951_v38 = vld [vmem:[#allocation8 + $0xc8] sm:$0xff]  ;;  %v1041_v22 = vld [vmem:[#allocation8 + $0x398] sm:$0xff]  ;;  %v1040_v55 = vld [vmem:[#allocation8 + $0x390] sm:$0xff] }
  0xcf   : > { %1189 = vmatpush1.msra.mxu0 %v956_v54  ;;  %v2393_v3 = vpop.eup %2392  ;;  %v541_v32 = vadd.f32 %v533_v61, %v501_v57  ;;  %v537_v4 = vmul.f32 0.6931472, %v2391_v63  ;;  %1095 = vmatprep.subr.mxu1 %v951_v38  ;;  %v1038_v54 = vld [vmem:[#allocation8 + $0x380] sm:$0xff]  ;;  %v1037_v57 = vld [vmem:[#allocation8 + $0x378] sm:$0xff]  ;;  %v1036_v58 = vld [vmem:[#allocation8 + $0x370] sm:$0xff] }
  0xd0   : > { %545 = vst [vmem:[%s3340_s15] sm:$0xff] %v540_v1  ;;  %v542_v33 = vadd.f32 %v535_v2, %v502_v59  ;;  %v539_v36 = vmul.f32 0.6931472, %v2393_v3  ;;  %1190 = vmatprep.subr.mxu0 %v953_v6  ;;  %1096 = vmatpush1.msra.mxu1 %v950_v7  ;;  %v1031_v59 = vld [vmem:[#allocation8 + $0x348] sm:$0xff]  ;;  %v1033_v60 = vld [vmem:[#allocation8 + $0x358] sm:$0xff]  ;;  %v1030_v61 = vld [vmem:[#allocation8 + $0x340] sm:$0xff] }
  0xd1   : > { %546 = vst [vmem:[%s3340_s15 + $0x8] sm:$0xff] %v541_v32  ;;  %v543_v37 = vadd.f32 %v537_v4, %v503_v62  ;;  %1191 = vmatpush1.msra.mxu0 %v952_v8  ;;  %1097 = vmatprep.subr.mxu1 %v947_v9  ;;  %v1032_v62 = vld [vmem:[#allocation8 + $0x350] sm:$0xff]  ;;  %v1027_v63 = vld [vmem:[#allocation8 + $0x328] sm:$0xff]  ;;  %v1029_v1 = vld [vmem:[#allocation8 + $0x338] sm:$0xff] }
  0xd2   : > { %547 = vst [vmem:[%s3340_s15 + $0x10] sm:$0xff] %v542_v33  ;;  %v544_v5 = vadd.f32 %v539_v36, %v504_v24  ;;  %1192 = vmatprep.subr.mxu0 %v949_v10  ;;  %1098 = vmatpush1.msra.mxu1 %v946_v11  ;;  %v1026_v2 = vld [vmem:[#allocation8 + $0x320] sm:$0xff]  ;;  %v1028_v24 = vld [vmem:[#allocation8 + $0x330] sm:$0xff]  ;;  %v1023_v3 = vld [vmem:[#allocation8 + $0x308] sm:$0xff] }
  0xd3   : > { %548 = vst [vmem:[%s3340_s15 + $0x18] sm:$0xff] %v543_v37  ;;  %1193 = vmatpush1.msra.mxu0 %v948_v12  ;;  %1099 = vmatprep.subr.mxu1 %v943_v13  ;;  %v1025_v32 = vld [vmem:[#allocation8 + $0x318] sm:$0xff]  ;;  %v1022_v4 = vld [vmem:[#allocation8 + $0x300] sm:$0xff]  ;;  %v1024_v33 = vld [vmem:[#allocation8 + $0x310] sm:$0xff] }
  0xd4   : > { %549 = vst [vmem:[%s3340_s15 + $0x20] sm:$0xff] %v544_v5  ;;  %1194 = vmatprep.subr.mxu0 %v945_v14  ;;  %1100 = vmatpush1.msra.mxu1 %v942_v15  ;;  %v1019_v36 = vld [vmem:[#allocation8 + $0x2e8] sm:$0xff]  ;;  %v1021_v37 = vld [vmem:[#allocation8 + $0x2f8] sm:$0xff]  ;;  %v1018_v5 = vld [vmem:[#allocation8 + $0x2e0] sm:$0xff] }
  0xd5   : > { %1195 = vmatpush1.msra.mxu0 %v944_v17  ;;  %1101 = vmatprep.subr.mxu1 %v939_v18  ;;  %v1020_v38 = vld [vmem:[#allocation8 + $0x2f0] sm:$0xff]  ;;  %v1015_v6 = vld [vmem:[#allocation8 + $0x2c8] sm:$0xff]  ;;  %v1017_v7 = vld [vmem:[#allocation8 + $0x2d8] sm:$0xff] }
  0xd6   : > { %1196 = vmatprep.subr.mxu0 %v941_v20  ;;  %1102 = vmatpush1.msra.mxu1 %v938_v21  ;;  %v1014_v8 = vld [vmem:[#allocation8 + $0x2c0] sm:$0xff]  ;;  %v1016_v9 = vld [vmem:[#allocation8 + $0x2d0] sm:$0xff]  ;;  %v1011_v10 = vld [vmem:[#allocation8 + $0x2a8] sm:$0xff] }
  0xd7   : > { %1197 = vmatpush1.msra.mxu0 %v940_v25  ;;  %1103 = vmatprep.subr.mxu1 %v935_v26  ;;  %v1013_v11 = vld [vmem:[#allocation8 + $0x2b8] sm:$0xff]  ;;  %v1010_v12 = vld [vmem:[#allocation8 + $0x2a0] sm:$0xff]  ;;  %v1012_v13 = vld [vmem:[#allocation8 + $0x2b0] sm:$0xff] }
  0xd8   : > { %1198 = vmatprep.subr.mxu0 %v937_v27  ;;  %1104 = vmatpush1.msra.mxu1 %v934_v28  ;;  %v1007_v14 = vld [vmem:[#allocation8 + $0x288] sm:$0xff]  ;;  %v1009_v15 = vld [vmem:[#allocation8 + $0x298] sm:$0xff]  ;;  %v1006_v17 = vld [vmem:[#allocation8 + $0x280] sm:$0xff] }
  0xd9   : > { %1199 = vmatpush1.msra.mxu0 %v936_v29  ;;  %1105 = vmatprep.subr.mxu1 %v931_v30  ;;  %v1008_v18 = vld [vmem:[#allocation8 + $0x290] sm:$0xff]  ;;  %v1003_v20 = vld [vmem:[#allocation8 + $0x268] sm:$0xff]  ;;  %v1005_v21 = vld [vmem:[#allocation8 + $0x278] sm:$0xff] }
  0xda   : > { %1200 = vmatprep.subr.mxu0 %v933_v31  ;;  %1106 = vmatpush1.msra.mxu1 %v930_v34  ;;  %v1002_v25 = vld [vmem:[#allocation8 + $0x260] sm:$0xff]  ;;  %v1004_v26 = vld [vmem:[#allocation8 + $0x270] sm:$0xff]  ;;  %v999_v27 = vld [vmem:[#allocation8 + $0x248] sm:$0xff] }
  0xdb   : > { %1201 = vmatpush1.msra.mxu0 %v932_v35  ;;  %1107 = vmatprep.subr.mxu1 %v927_v39  ;;  %v1001_v28 = vld [vmem:[#allocation8 + $0x258] sm:$0xff]  ;;  %v998_v29 = vld [vmem:[#allocation8 + $0x240] sm:$0xff]  ;;  %v1000_v30 = vld [vmem:[#allocation8 + $0x250] sm:$0xff] }
  0xdc   : > { %1202 = vmatprep.subr.mxu0 %v929_v40  ;;  %1108 = vmatpush1.msra.mxu1 %v926_v41  ;;  %v995_v31 = vld [vmem:[#allocation8 + $0x228] sm:$0xff]  ;;  %v997_v34 = vld [vmem:[#allocation8 + $0x238] sm:$0xff]  ;;  %v994_v35 = vld [vmem:[#allocation8 + $0x220] sm:$0xff] }
  0xdd   : > { %1203 = vmatpush1.msra.mxu0 %v928_v42  ;;  %1109 = vmatprep.subr.mxu1 %v1051_v16  ;;  %v996_v39 = vld [vmem:[#allocation8 + $0x230] sm:$0xff]  ;;  %v991_v40 = vld [vmem:[#allocation8 + $0x208] sm:$0xff]  ;;  %v993_v41 = vld [vmem:[#allocation8 + $0x218] sm:$0xff] }
  0xde   : > { %1204 = vmatprep.subr.mxu0 %v1053_v43  ;;  %1110 = vmatpush2.msra.mxu1 %v1050_v44  ;;  %v990_v42 = vld [vmem:[#allocation8 + $0x200] sm:$0xff]  ;;  %v992_v16 = vld [vmem:[#allocation8 + $0x210] sm:$0xff]  ;;  %v1757_v43 = vld [vmem:[#allocation10 + $0x98] sm:$0xff]  ;;  %v585_v44 = vlaneseq }
  0xdf   : > { %1205 = vmatpush2.msra.mxu0 %v1052_v45  ;;  %1111 = vmatprep.subr.mxu1 %v1047_v46 }
  0xe0   : > { %1206 = vmatprep.subr.mxu0 %v1049_v47  ;;  %1112 = vmatpush2.msra.mxu1 %v1046_v48  ;;  %v3347_v45 = vshrl.u32 %v585_v44, 7  ;;  %v583_v47 = vld [vmem:[#allocation11 + $0x2] ss:$8 sm:$0x3] }
  0xe1   : > { %1207 = vmatpush2.msra.mxu0 %v1048_v49  ;;  %1113 = vmatprep.subr.mxu1 %v1043_v19 }
  0xe2   : > { %1208 = vmatprep.subr.mxu0 %v1045_v50  ;;  %1114 = vmatpush2.msra.mxu1 %v1042_v51  ;;  %v3350_v46 = vsub.s32 0, %v3347_v45  ;;  %v3353_v48 = vsub.s32 1, %v3347_v45 }
  0xe3   : > { %1209 = vmatpush2.msra.mxu0 %v1044_v52  ;;  %1115 = vmatprep.subr.mxu1 %v1039_v53 }
  0xe4   : > { %1210 = vmatprep.subr.mxu0 %v1041_v22  ;;  %1116 = vmatpush2.msra.mxu1 %v1038_v54  ;;  %v588_v49 = vrot.slane %v583_v47, %v3350_v46  ;;  %v592_v19 = vrot.slane %v583_v47, %v3353_v48 }
  0xe5   : > { %1211 = vmatpush2.msra.mxu0 %v1040_v55  ;;  %1117 = vmatprep.subr.mxu1 %v1035_v56 }
  0xe6   : > { %1212 = vmatprep.subr.mxu0 %v1037_v57  ;;  %1118 = vmatpush2.msra.mxu1 %v1034_v23 }
  0xe7   : > { %1213 = vmatpush2.msra.mxu0 %v1036_v58  ;;  %1119 = vmatprep.subr.mxu1 %v1031_v59 }
  0xe8   : > { %1214 = vmatprep.subr.mxu0 %v1033_v60  ;;  %1120 = vmatpush2.msra.mxu1 %v1030_v61 }
  0xe9   : > { %1215 = vmatpush2.msra.mxu0 %v1032_v62  ;;  %1121 = vmatprep.subr.mxu1 %v1027_v63 }
  0xea   : > { %1216 = vmatprep.subr.mxu0 %v1029_v1  ;;  %1122 = vmatpush2.msra.mxu1 %v1026_v2 }
  0xeb   : > { %1217 = vmatpush2.msra.mxu0 %v1028_v24  ;;  %1123 = vmatprep.subr.mxu1 %v1023_v3 }
  0xec   : > { %1218 = vmatprep.subr.mxu0 %v1025_v32  ;;  %1124 = vmatpush2.msra.mxu1 %v1022_v4 }
  0xed   : > { %1219 = vmatpush2.msra.mxu0 %v1024_v33  ;;  %1125 = vmatprep.subr.mxu1 %v1019_v36 }
  0xee   : > { %1220 = vmatprep.subr.mxu0 %v1021_v37  ;;  %1126 = vmatpush2.msra.mxu1 %v1018_v5 }
  0xef   : > { %1221 = vmatpush2.msra.mxu0 %v1020_v38  ;;  %1127 = vmatprep.subr.mxu1 %v1015_v6 }
  0xf0   : > { %1222 = vmatprep.subr.mxu0 %v1017_v7  ;;  %1128 = vmatpush2.msra.mxu1 %v1014_v8 }
  0xf1   : > { %1223 = vmatpush2.msra.mxu0 %v1016_v9  ;;  %1129 = vmatprep.subr.mxu1 %v1011_v10 }
  0xf2   : > { %1224 = vmatprep.subr.mxu0 %v1013_v11  ;;  %1130 = vmatpush2.msra.mxu1 %v1010_v12 }
  0xf3   : > { %1225 = vmatpush2.msra.mxu0 %v1012_v13  ;;  %1131 = vmatprep.subr.mxu1 %v1007_v14 }
  0xf4   : > { %1226 = vmatprep.subr.mxu0 %v1009_v15  ;;  %1132 = vmatpush2.msra.mxu1 %v1006_v17 }
  0xf5   : > { %1227 = vmatpush2.msra.mxu0 %v1008_v18  ;;  %1133 = vmatprep.subr.mxu1 %v1003_v20 }
  0xf6   : > { %1228 = vmatprep.subr.mxu0 %v1005_v21  ;;  %1134 = vmatpush2.msra.mxu1 %v1002_v25 }
  0xf7   : > { %1229 = vmatpush2.msra.mxu0 %v1004_v26  ;;  %1135 = vmatprep.subr.mxu1 %v999_v27 }
  0xf8   : > { %1230 = vmatprep.subr.mxu0 %v1001_v28  ;;  %1136 = vmatpush2.msra.mxu1 %v998_v29 }
  0xf9   : > { %1231 = vmatpush2.msra.mxu0 %v1000_v30  ;;  %1137 = vmatprep.subr.mxu1 %v995_v31 }
  0xfa   : > { %1232 = vmatprep.subr.mxu0 %v997_v34  ;;  %1138 = vmatpush2.msra.mxu1 %v994_v35 }
  0xfb   : > { %1233 = vmatpush2.msra.mxu0 %v996_v39  ;;  %1139 = vmatprep.subr.mxu1 %v991_v40 }
  0xfc   : > { %1234 = vmatprep.subr.mxu0 %v993_v41  ;;  %1140 = vmatpush2.msra.mxu1 %v990_v42 }
  0xfd   : > { %1235 = vmatpush2.msra.mxu0 %v992_v16  ;;  %1799 = vmatprep.subr.mxu1 %v1757_v43 }
 0x17e   : > { %v661_v50 = vpop.f32.mrf.mxu0 }
 0x17f   : > { %v3357_v51 = vadd.f32 %v661_v50, %v588_v49 }
 0x180   : > { %v663_v52 = vpop.f32.mrf.mxu0 }
 0x181   : > { %v700_v53 = vand.u32 2147483647, %v3357_v51  ;;  %v3360_v22 = vadd.f32 %v663_v52, %v592_v19 }
 0x182   : > { %v667_v54 = vpop.f32.mrf.mxu0 }
 0x183   : > { %v710_v55 = vsub.f32 0.0, %v700_v53  ;;  %v701_v56 = vand.u32 2147483647, %v3360_v22  ;;  %v3363_v57 = vadd.f32 %v667_v54, %v588_v49 }
 0x184   : > { %v669_v23 = vpop.f32.mrf.mxu0 }
 0x185   : > { %v720_v58 = vmul.f32 1.442695, %v710_v55  ;;  %v711_v59 = vsub.f32 0.0, %v701_v56  ;;  %v702_v60 = vand.u32 2147483647, %v3363_v57  ;;  %v3366_v61 = vadd.f32 %v669_v23, %v592_v19 }
 0x186   : > { %v673_v62 = vpop.f32.mrf.mxu0  ;;  %v781_v56 = vld [vmem:[#allocation11 + $0x3] ss:$8 sm:$0x3] }
 0x187   : > { %2394 = vpow2.f32 %v720_v58  ;;  %v722_v63 = vmul.f32 1.442695, %v711_v59  ;;  %v712_v1 = vsub.f32 0.0, %v702_v60  ;;  %v3368_v2 = vadd.f32 %v673_v62, %v588_v49  ;;  %v804_v59 = vld [vmem:[#allocation11 + $0x4] ss:$8 sm:$0x3] }
 0x188   : > { %v703_v24 = vand.u32 2147483647, %v3366_v61  ;;  %v675_v3 = vpop.f32.mrf.mxu0  ;;  %v690_v62 = vmax.f32 %v3357_v51, 0.0 }
 0x189   : > { %2396 = vpow2.f32 %v722_v63  ;;  %v724_v32 = vmul.f32 1.442695, %v712_v1  ;;  %v704_v4 = vand.u32 2147483647, %v3368_v2  ;;  %v3372_v36 = vadd.f32 %v675_v3, %v592_v19 }
 0x18a   : > { %v713_v33 = vsub.f32 0.0, %v703_v24  ;;  %v679_v37 = vpop.f32.mrf.mxu0  ;;  %v3389_v1 = vrot.slane %v781_v56, %v3350_v46 }
 0x18b   : > { %2398 = vpow2.f32 %v724_v32  ;;  %v714_v5 = vsub.f32 0.0, %v704_v4  ;;  %v3374_v38 = vadd.f32 %v679_v37, %v588_v49  ;;  %v705_v7 = vand.u32 2147483647, %v3372_v36 }
 0x18c   : > { %v726_v6 = vmul.f32 1.442695, %v713_v33  ;;  %v681_v8 = vpop.f32.mrf.mxu0  ;;  %v3392_v32 = vrot.slane %v781_v56, %v3353_v48  ;;  %v691_v33 = vmax.f32 %v3360_v22, 0.0 }
 0x18d   : > { %v728_v9 = vmul.f32 1.442695, %v714_v5  ;;  %v706_v10 = vand.u32 2147483647, %v3374_v38  ;;  %v3378_v11 = vadd.f32 %v681_v8, %v592_v19  ;;  %v715_v12 = vsub.f32 0.0, %v705_v7 }
 0x18e   : > { %2400 = vpow2.f32 %v726_v6  ;;  %v685_v13 = vpop.f32.mrf.mxu0  ;;  %v3396_v6 = vrot.slane %v804_v59, %v3350_v46  ;;  %v3399_v8 = vrot.slane %v804_v59, %v3353_v48 }
 0x18f   : > { %2402 = vpow2.f32 %v728_v9  ;;  %v716_v14 = vsub.f32 0.0, %v706_v10  ;;  %v707_v15 = vand.u32 2147483647, %v3378_v11  ;;  %v730_v17 = vmul.f32 1.442695, %v715_v12 }
 0x190   : > { %v3381_v18 = vadd.f32 %v685_v13, %v588_v49  ;;  %v687_v20 = vpop.f32.mrf.mxu0  ;;  %v692_v9 = vmax.f32 %v3363_v57, 0.0 }
 0x191   : > { %v732_v21 = vmul.f32 1.442695, %v716_v14  ;;  %v717_v25 = vsub.f32 0.0, %v707_v15  ;;  %v3383_v26 = vadd.f32 %v687_v20, %v592_v19  ;;  %2404 = vpow2.f32 %v730_v17  ;;  %v1756_v14 = vld [vmem:[#allocation10 + $0x90] sm:$0xff] }
 0x192   : > { %v708_v27 = vand.u32 2147483647, %v3381_v18 }
 0x193   : > { %2406 = vpow2.f32 %v732_v21  ;;  %v734_v28 = vmul.f32 1.442695, %v717_v25  ;;  %v709_v29 = vand.u32 2147483647, %v3383_v26  ;;  %v1755_v21 = vld [vmem:[#allocation10 + $0x88] sm:$0xff] }
 0x194   : > { %v2395_v30 = vpop.eup %2394  ;;  %v718_v31 = vsub.f32 0.0, %v708_v27  ;;  %v693_v27 = vmax.f32 %v3366_v61, 0.0  ;;  %v695_v61 = vmax.f32 %v3372_v36, 0.0  ;;  %v697_v36 = vmax.f32 %v3378_v11, 0.0  ;;  %v1751_v11 = vld [vmem:[#allocation10 + $0x68] sm:$0xff] }
 0x195   : > { %v740_v34 = vadd.f32 1.0, %v2395_v30  ;;  %2408 = vpow2.f32 %v734_v28  ;;  %v719_v35 = vsub.f32 0.0, %v709_v29  ;;  %v1754_v28 = vld [vmem:[#allocation10 + $0x80] sm:$0xff] }
 0x196   : > { %v2397_v39 = vpop.eup %2396  ;;  %v736_v40 = vmul.f32 1.442695, %v718_v31 }
 0x197   : > { %2410 = vlog2.f32 %v740_v34  ;;  %v741_v41 = vadd.f32 1.0, %v2397_v39  ;;  %v738_v42 = vmul.f32 1.442695, %v719_v35  ;;  %v694_v34 = vmax.f32 %v3368_v2, 0.0 }
 0x198   : > { %v2399_v16 = vpop.eup %2398  ;;  %2412 = vpow2.f32 %v736_v40 }
 0x199   : > { %2414 = vlog2.f32 %v741_v41  ;;  %v742_v43 = vadd.f32 1.0, %v2399_v16 }
 0x19a   : > { %2416 = vpow2.f32 %v738_v42 }
 0x19b   : > { %v2401_v44 = vpop.eup %2400  ;;  %2418 = vlog2.f32 %v742_v43  ;;  %v1753_v43 = vld [vmem:[#allocation10 + $0x78] sm:$0xff] }
 0x19c   : > { %v2403_v47 = vpop.eup %2402  ;;  %v743_v49 = vadd.f32 1.0, %v2401_v44 }
 0x19d   : > { %v744_v19 = vadd.f32 1.0, %v2403_v47  ;;  %v696_v47 = vmax.f32 %v3374_v38, 0.0 }
 0x19e   : > { %2420 = vlog2.f32 %v743_v49  ;;  %v2405_v50 = vpop.eup %2404 }
 0x19f   : > { %2422 = vlog2.f32 %v744_v19  ;;  %v745_v53 = vadd.f32 1.0, %v2405_v50  ;;  %v1752_v50 = vld [vmem:[#allocation10 + $0x70] sm:$0xff] }
 0x1a0   : > { %v2407_v52 = vpop.eup %2406 }
 0x1a1   : > { %v746_v54 = vadd.f32 1.0, %v2407_v52  ;;  %2424 = vlog2.f32 %v745_v53 }
 0x1a2   : > { %v2409_v55 = vpop.eup %2408 }
 0x1a3   : > { %2426 = vlog2.f32 %v746_v54  ;;  %v747_v23 = vadd.f32 1.0, %v2409_v55 }
 0x1a4   : > { %v2411_v58 = vpop.eup %2410 }
 0x1a5   : > { %v2413_v60 = vpop.eup %2412  ;;  %2428 = vlog2.f32 %v747_v23  ;;  %v751_v63 = vmul.f32 0.6931472, %v2411_v58 }
 0x1a6   : > { %v2415_v24 = vpop.eup %2414  ;;  %v748_v3 = vadd.f32 1.0, %v2413_v60 }
 0x1a7   : > { %v2417_v4 = vpop.eup %2416  ;;  %v753_v37 = vmul.f32 0.6931472, %v2415_v24  ;;  %v770_v5 = vadd.f32 %v751_v63, %v690_v62 }
 0x1a8   : > { %v2419_v7 = vpop.eup %2418  ;;  %2430 = vlog2.f32 %v748_v3  ;;  %v749_v51 = vadd.f32 1.0, %v2417_v4 }
 0x1a9   : > { %v771_v10 = vadd.f32 %v753_v37, %v691_v33  ;;  %v793_v12 = vmul.f32 %v3389_v1, %v770_v5  ;;  %v755_v13 = vmul.f32 0.6931472, %v2419_v7  ;;  %v1750_v7 = vld [vmem:[#allocation10 + $0x60] sm:$0xff] }
 0x1aa   : > { %2432 = vlog2.f32 %v749_v51  ;;  %v698_v51 = vmax.f32 %v3381_v18, 0.0 }
 0x1ab   : > { %v2421_v22 = vpop.eup %2420  ;;  %v794_v15 = vmul.f32 %v3392_v32, %v771_v10  ;;  %1141 = vmatprep.mubr.f32.mxu1 %v771_v10  ;;  %1236 = vmatprep.mubr.f32.mxu0 %v771_v10  ;;  %v3405_v17 = vadd.f32 %v3396_v6, %v793_v12  ;;  %v772_v20 = vadd.f32 %v755_v13, %v692_v9 }
 0x1ac   : > { %v2423_v25 = vpop.eup %2422  ;;  %1142 = vmatmul.mubr.f32.vlgmr.msra.gmra.mxu1 %v770_v5  ;;  %1237 = vmatmul.mubr.f32.vlgmr.msra.gmra.mxu0 %v770_v5  ;;  %v757_v57 = vmul.f32 0.6931472, %v2421_v22 }
 0x1ad   : > { %v3409_v29 = vadd.f32 %v3399_v8, %v794_v15  ;;  %v836_v30 = vand.u32 2147483647, %v3405_v17  ;;  %v795_v31 = vmul.f32 %v3389_v1, %v772_v20  ;;  %1800 = vmatpush1.msra.mxu1 %v1756_v14  ;;  %v759_v39 = vmul.f32 0.6931472, %v2423_v25 }
 0x1ae   : > { %v773_v35 = vadd.f32 %v757_v57, %v693_v27  ;;  %1801 = vmatprep.subr.mxu1 %v1755_v21  ;;  %v2425_v40 = vpop.eup %2424  ;;  %v1748_v27 = vld [vmem:[#allocation10 + $0x50] sm:$0xff] }
 0x1af   : > { %v837_v41 = vand.u32 2147483647, %v3409_v29  ;;  %v846_v42 = vsub.f32 0.0, %v836_v30  ;;  %v3417_v16 = vadd.f32 %v3396_v6, %v795_v31  ;;  %1802 = vmatpush1.msra.mxu1 %v1754_v28  ;;  %v761_v2 = vmul.f32 0.6931472, %v2425_v40 }
 0x1b0   : > { %v2427_v44 = vpop.eup %2426  ;;  %v796_v49 = vmul.f32 %v3392_v32, %v773_v35  ;;  %1147 = vmatprep.mubr.f32.mxu1 %v773_v35  ;;  %1242 = vmatprep.mubr.f32.mxu0 %v773_v35  ;;  %v774_v19 = vadd.f32 %v759_v39, %v694_v34  ;;  %v1747_v34 = vld [vmem:[#allocation10 + $0x48] sm:$0xff]  ;;  %v699_v35 = vmax.f32 %v3383_v26, 0.0  ;;  %v1745_v26 = vld [vmem:[#allocation10 + $0x38] sm:$0xff] }
 0x1b1   : > { %v847_v52 = vsub.f32 0.0, %v837_v41  ;;  %v856_v53 = vmul.f32 1.442695, %v846_v42  ;;  %v838_v54 = vand.u32 2147483647, %v3417_v16  ;;  %1148 = vmatmul.mubr.f32.gmra.mxu1 %v772_v20  ;;  %1243 = vmatmul.mubr.f32.gmra.mxu0 %v772_v20  ;;  %v775_v38 = vadd.f32 %v761_v2, %v695_v61  ;;  %v1749_v20 = vld [vmem:[#allocation10 + $0x58] sm:$0xff] }
 0x1b2   : > { %v2429_v55 = vpop.eup %2428  ;;  %v3424_v56 = vadd.f32 %v3399_v8, %v796_v49  ;;  %v797_v23 = vmul.f32 %v3389_v1, %v774_v19  ;;  %v763_v58 = vmul.f32 0.6931472, %v2427_v44  ;;  %1803 = vmatprep.subr.mxu1 %v1753_v43  ;;  %v1746_v61 = vld [vmem:[#allocation10 + $0x40] sm:$0xff] }
 0x1b3   : > { %v858_v59 = vmul.f32 1.442695, %v847_v52  ;;  %2434 = vpow2.f32 %v856_v53  ;;  %v848_v60 = vsub.f32 0.0, %v838_v54  ;;  %v765_v62 = vmul.f32 0.6931472, %v2429_v55  ;;  %1804 = vmatpush1.msra.mxu1 %v1752_v50  ;;  %1153 = vmatprep.mubr.f32.mxu1 %v775_v38  ;;  %v1743_v54 = vld [vmem:[#allocation10 + $0x28] sm:$0xff] }
 0x1b4   : > { %v839_v63 = vand.u32 2147483647, %v3424_v56  ;;  %v798_v24 = vmul.f32 %v3392_v32, %v775_v38  ;;  %1248 = vmatprep.mubr.f32.mxu0 %v775_v38  ;;  %v3430_v3 = vadd.f32 %v3396_v6, %v797_v23  ;;  %v776_v5 = vadd.f32 %v763_v58, %v696_v47  ;;  %1805 = vmatprep.subr.mxu1 %v1751_v11  ;;  %v1742_v23 = vld [vmem:[#allocation10 + $0x20] sm:$0xff]  ;;  %v1739_v11 = vld [vmem:[#allocation10 + $0x8] sm:$0xff] }
 0x1b5   : > { %v2431_v4 = vpop.eup %2430  ;;  %2436 = vpow2.f32 %v858_v59  ;;  %v860_v33 = vmul.f32 1.442695, %v848_v60  ;;  %1154 = vmatmul.mubr.f32.gmra.mxu1 %v774_v19  ;;  %1249 = vmatmul.mubr.f32.gmra.mxu0 %v774_v19  ;;  %v777_v37 = vadd.f32 %v765_v62, %v697_v36  ;;  %v1744_v36 = vld [vmem:[#allocation10 + $0x30] sm:$0xff] }
 0x1b6   : > { %v849_v9 = vsub.f32 0.0, %v839_v63  ;;  %v3434_v10 = vadd.f32 %v3399_v8, %v798_v24  ;;  %v840_v12 = vand.u32 2147483647, %v3430_v3  ;;  %v799_v22 = vmul.f32 %v3389_v1, %v776_v5  ;;  %1806 = vmatpush1.msra.mxu1 %v1750_v7  ;;  %v1740_v62 = vld [vmem:[#allocation10 + $0x10] sm:$0xff] }
 0x1b7   : > { %v2433_v13 = vpop.eup %2432  ;;  %2438 = vpow2.f32 %v860_v33  ;;  %v800_v14 = vmul.f32 %v3392_v32, %v777_v37  ;;  %1159 = vmatprep.mubr.f32.mxu1 %v777_v37  ;;  %1254 = vmatprep.mubr.f32.mxu0 %v777_v37  ;;  %v767_v15 = vmul.f32 0.6931472, %v2431_v4  ;;  %v1738_v33 = vld [vmem:[#allocation10] sm:$0xff] }
 0x1b8   : > { %v862_v21 = vmul.f32 1.442695, %v849_v9  ;;  %v841_v18 = vand.u32 2147483647, %v3434_v10  ;;  %v850_v25 = vsub.f32 0.0, %v840_v12  ;;  %v3444_v28 = vadd.f32 %v3396_v6, %v799_v22  ;;  %1807 = vmatprep.subr.mxu1 %v1749_v20  ;;  %v1735_v20 = vld [vmem:[%s3271_s3 + $0x10] sm:$0xff] }
 0x1b9   : > { %v3441_v57 = vadd.f32 %v3399_v8, %v800_v14  ;;  %1160 = vmatmul.mubr.f32.gmra.mxu1 %v776_v5  ;;  %1255 = vmatmul.mubr.f32.gmra.mxu0 %v776_v5  ;;  %v769_v30 = vmul.f32 0.6931472, %v2433_v13  ;;  %v778_v31 = vadd.f32 %v767_v15, %v698_v51  ;;  %v1733_v5 = vld [vmem:[%s3271_s3] sm:$0xff]  ;;  %v1734_v13 = vld [vmem:[%s3271_s3 + $0x8] sm:$0xff] }
 0x1ba   : > { %2440 = vpow2.f32 %v862_v21  ;;  %v851_v39 = vsub.f32 0.0, %v841_v18  ;;  %v864_v40 = vmul.f32 1.442695, %v850_v25  ;;  %v842_v42 = vand.u32 2147483647, %v3444_v28  ;;  %1808 = vmatpush1.msra.mxu1 %v1748_v27 }
 0x1bb   : > { %v843_v41 = vand.u32 2147483647, %v3441_v57  ;;  %v779_v44 = vadd.f32 %v769_v30, %v699_v35  ;;  %v801_v47 = vmul.f32 %v3389_v1, %v778_v31  ;;  %1809 = vmatprep.subr.mxu1 %v1747_v34  ;;  %v1736_v35 = vld [vmem:[%s3271_s3 + $0x18] sm:$0xff] }
 0x1bc   : > { %v866_v43 = vmul.f32 1.442695, %v851_v39  ;;  %2442 = vpow2.f32 %v864_v40  ;;  %v852_v2 = vsub.f32 0.0, %v842_v42  ;;  %1810 = vmatpush1.msra.mxu1 %v1746_v61  ;;  %v827_v61 = vmax.f32 %v3409_v29, 0.0  ;;  %v1737_v29 = vld [vmem:[%s3271_s3 + $0x20] sm:$0xff]  ;;  %s2808_s3 = sshll.u32 %s2985_s17, 4  ;;  %s2809_s3 = int_to_ptr.vmem [resolvable:$false] %s2808_s3 }
 0x1bd   : > { %v853_v49 = vsub.f32 0.0, %v843_v41  ;;  %v802_v19 = vmul.f32 %v3392_v32, %v779_v44  ;;  %1165 = vmatprep.mubr.f32.mxu1 %v779_v44  ;;  %1260 = vmatprep.mubr.f32.mxu0 %v779_v44  ;;  %v3452_v50 = vadd.f32 %v3396_v6, %v801_v47  ;;  %v1741_v6 = vld [vmem:[#allocation10 + $0x18] sm:$0xff]  ;;  %p2811_p4 = scmp.lt.s32.totalorder %s3631_s24, %s2809_s3 }
 0x1be   : > { %2444 = vpow2.f32 %v866_v43  ;;  %v868_v53 = vmul.f32 1.442695, %v852_v2  ;;  %1166 = vmatmul.mubr.f32.gmra.mxu1 %v778_v31  ;;  %1261 = vmatmul.mubr.f32.gmra.mxu0 %v778_v31  ;;  %v826_v31 = vmax.f32 %v3405_v17, 0.0 }
 0x1bf   : > { %v870_v52 = vmul.f32 1.442695, %v853_v49  ;;  %v3455_v55 = vadd.f32 %v3399_v8, %v802_v19  ;;  %v844_v38 = vand.u32 2147483647, %v3452_v50  ;;  %1811 = vmatprep.subr.mxu1 %v1745_v26  ;;  %1851 = vmatprep.mubr.f32.mxu1 %v2984_v0  ;;  %v828_v49 = vmax.f32 %v3417_v16, 0.0 }
 0x1c0   : > { %v2435_v1 = vpop.eup %2434  ;;  %1812 = vmatpush1.msra.mxu1 %v1744_v36 }
 0x1c1   : > { %v876_v32 = vadd.f32 1.0, %v2435_v1  ;;  %2446 = vpow2.f32 %v870_v52  ;;  %v845_v59 = vand.u32 2147483647, %v3455_v55  ;;  %v854_v60 = vsub.f32 0.0, %v844_v38  ;;  %1813 = vmatprep.subr.mxu1 %v1743_v54 }
 0x1c2   : > { %v2437_v58 = vpop.eup %2436  ;;  %2448 = vpow2.f32 %v868_v53  ;;  %1814 = vmatpush1.msra.mxu1 %v1742_v23  ;;  %v829_v52 = vmax.f32 %v3424_v56, 0.0  ;;  %v831_v23 = vmax.f32 %v3434_v10, 0.0  ;;  %v834_v10 = vmax.f32 %v3452_v50, 0.0 }
 0x1c3   : > { %v877_v8 = vadd.f32 1.0, %v2437_v58  ;;  %2450 = vlog2.f32 %v876_v32  ;;  %v855_v24 = vsub.f32 0.0, %v845_v59  ;;  %v872_v4 = vmul.f32 1.442695, %v854_v60  ;;  %1815 = vmatprep.subr.mxu1 %v1741_v6 }
 0x1c4   : > { %v2439_v63 = vpop.eup %2438  ;;  %1816 = vmatpush1.msra.mxu1 %v1740_v62  ;;  %v833_v60 = vmax.f32 %v3441_v57, 0.0 }
 0x1c5   : > { %2452 = vlog2.f32 %v877_v8  ;;  %v878_v37 = vadd.f32 1.0, %v2439_v63  ;;  %v874_v7 = vmul.f32 1.442695, %v855_v24  ;;  %1817 = vmatprep.subr.mxu1 %v1739_v11 }
 0x1c6   : > { %2454 = vpow2.f32 %v872_v4  ;;  %1818 = vmatpush1.msra.mxu1 %v1738_v33 }
 0x1c7   : > { %v2441_v51 = vpop.eup %2440  ;;  %2456 = vlog2.f32 %v878_v37  ;;  %2223 = vmatmul.mubr.msk.f32.vlgmr.msra.gmra.mxu1 %vm1771_vm0, %v1733_v5  ;;  %v835_v37 = vmax.f32 %v3455_v55, 0.0 }
 0x1c8   : > { %v879_v9 = vadd.f32 1.0, %v2441_v51  ;;  %2458 = vpow2.f32 %v874_v7  ;;  %1857 = vmatprep.mubr.f32.mxu1 %v2984_v0  ;;  %v3500_v51 = vsub.s32 2, %v3347_v45 }
 0x1c9   : > { %v2443_v12 = vpop.eup %2442 }
 0x1ca   : > { %2460 = vlog2.f32 %v879_v9  ;;  %v880_v14 = vadd.f32 1.0, %v2443_v12  ;;  %v3503_v9 = vsub.s32 3, %v3347_v45 }
 0x1cb   : > { %v2445_v22 = vpop.eup %2444  ;;  %2224 = vmatmul.mubr.msk.f32.gmra.mxu1 %vm1771_vm0, %v1734_v13 }
 0x1cc   : > { %v881_v15 = vadd.f32 1.0, %v2445_v22  ;;  %2462 = vlog2.f32 %v880_v14  ;;  %1863 = vmatprep.mubr.f32.mxu1 %v2984_v0 }
 0x1ce   : > { %v2447_v21 = vpop.eup %2446  ;;  %2464 = vlog2.f32 %v881_v15 }
 0x1cf   : > { %v2449_v18 = vpop.eup %2448  ;;  %v883_v25 = vadd.f32 1.0, %v2447_v21  ;;  %2225 = vmatmul.mubr.msk.f32.gmra.mxu1 %vm1771_vm0, %v1735_v20 }
 0x1d0   : > { %v2451_v27 = vpop.eup %2450  ;;  %v882_v30 = vadd.f32 1.0, %v2449_v18  ;;  %1869 = vmatprep.mubr.f32.mxu1 %v2984_v0 }
 0x1d1   : > { %v887_v34 = vmul.f32 0.6931472, %v2451_v27  ;;  %2466 = vlog2.f32 %v883_v25 }
 0x1d2   : > { %v2453_v39 = vpop.eup %2452  ;;  %2468 = vlog2.f32 %v882_v30 }
 0x1d3   : > { %v2455_v40 = vpop.eup %2454  ;;  %v889_v41 = vmul.f32 0.6931472, %v2453_v39  ;;  %v906_v42 = vadd.f32 %v887_v34, %v826_v31  ;;  %2226 = vmatmul.mubr.msk.f32.gmra.mxu1 %vm1771_vm0, %v1736_v35 }
 0x1d4   : > { %v2457_v43 = vpop.eup %2456  ;;  %v884_v44 = vadd.f32 1.0, %v2455_v40  ;;  %1875 = vmatprep.mubr.f32.mxu1 %v2984_v0  ;;  %v830_v0 = vmax.f32 %v3430_v3, 0.0  ;;  %v832_v3 = vmax.f32 %v3444_v28, 0.0  ;;  %v1055_v28 = vld [vmem:[#allocation11 + $0x5] ss:$8 sm:$0xf] }
 0x1d5   : > { %v2459_v47 = vpop.eup %2458  ;;  %v907_v17 = vadd.f32 %v889_v41, %v827_v61  ;;  %916 = vst [vmem:[%s3476_s27] sm:$0xff] %v906_v42  ;;  %v891_v2 = vmul.f32 0.6931472, %v2457_v43  ;;  %v3506_v12 = vrot.slane %v1055_v28, %v3350_v46  ;;  %v3509_v50 = vrot.slane %v1055_v28, %v3500_v51 }
 0x1d6   : > { %v885_v26 = vadd.f32 1.0, %v2459_v47  ;;  %2470 = vlog2.f32 %v884_v44  ;;  %v3512_v14 = vrot.slane %v1055_v28, %v3353_v48  ;;  %v3515_v22 = vrot.slane %v1055_v28, %v3503_v9 }
 0x1d7   : > { %v2461_v19 = vpop.eup %2460  ;;  %917 = vst [vmem:[%s3476_s27 + $0x8] sm:$0xff] %v907_v17  ;;  %v908_v36 = vadd.f32 %v891_v2, %v828_v49  ;;  %2227 = vmatmul.mubr.msk.f32.gmra.mxu1 %vm1771_vm0, %v1737_v29 }
 0x1d8   : > { %v893_v53 = vmul.f32 0.6931472, %v2461_v19  ;;  %2472 = vlog2.f32 %v885_v26 }
 0x1d9   : > { %v2463_v54 = vpop.eup %2462  ;;  %918 = vst [vmem:[%s3476_s27 + $0x10] sm:$0xff] %v908_v36 }
 0x1da   : > { %v909_v16 = vadd.f32 %v893_v53, %v829_v52  ;;  %v895_v1 = vmul.f32 0.6931472, %v2463_v54 }
 0x1db   : > { %v2465_v38 = vpop.eup %2464 }
 0x1dc   : > { %919 = vst [vmem:[%s3476_s27 + $0x18] sm:$0xff] %v909_v16  ;;  %v897_v32 = vmul.f32 0.6931472, %v2465_v38  ;;  %v910_v56 = vadd.f32 %v895_v1, %v830_v0 }
 0x1de   : > { %v2467_v6 = vpop.eup %2466  ;;  %v911_v58 = vadd.f32 %v897_v32, %v831_v23  ;;  %920 = vst [vmem:[%s3476_s27 + $0x20] sm:$0xff] %v910_v56 }
 0x1df   : > { %v2469_v59 = vpop.eup %2468  ;;  %v901_v62 = vmul.f32 0.6931472, %v2467_v6 }
 0x1e0   : > { %921 = vst [vmem:[%s3476_s27 + $0x28] sm:$0xff] %v911_v58  ;;  %v899_v8 = vmul.f32 0.6931472, %v2469_v59 }
 0x1e1   : > { %v913_v11 = vadd.f32 %v901_v62, %v833_v60 }
 0x1e2   : > { %v912_v63 = vadd.f32 %v899_v8, %v832_v3 }
 0x1e3   : > { %v2471_v24 = vpop.eup %2470  ;;  %923 = vst [vmem:[%s3476_s27 + $0x38] sm:$0xff] %v913_v11 }
 0x1e4   : > { %922 = vst [vmem:[%s3476_s27 + $0x30] sm:$0xff] %v912_v63  ;;  %v903_v4 = vmul.f32 0.6931472, %v2471_v24 }
 0x1e5   : > { %v2473_v33 = vpop.eup %2472 }
 0x1e6   : > { %v905_v5 = vmul.f32 0.6931472, %v2473_v33  ;;  %v914_v57 = vadd.f32 %v903_v4, %v834_v10 }
 0x1e8   : > { %v915_v7 = vadd.f32 %v905_v5, %v835_v37  ;;  %924 = vst [vmem:[%s3476_s27 + $0x40] sm:$0xff] %v914_v57 }
 0x1ea   : > { %925 = vst [vmem:[%s3476_s27 + $0x48] sm:$0xff] %v915_v7  ;;  %v1448_v7 = vld [vmem:[#allocation11 + $0x6] ss:$8 sm:$0xf]  ;;  %s2810_s27 = scalar_lea.vmem %s2809_s3, 2560 }
 0x1eb   : > { %p2812_p6 = scmp.lt.s32.totalorder %s2810_s27, %s2804_s18 }
 0x1ed   : > { %p2813_p1 = por %p2812_p6, %p2811_p4 }
 0x1ef   : > { %p2814_p5 = pnand %p2813_p1, %p2807_p2 }
 0x26c   : > { %v1143_v13 = vpop.f32.mrf.mxu1  ;;  %v1238_v55 = vpop.f32.mrf.mxu0 }
 0x26d   : > { %v3518_v15 = vadd.f32 %v1143_v13, %v3506_v12  ;;  %v3521_v45 = vadd.f32 %v1238_v55, %v3509_v50 }
 0x26e   : > { %v1145_v20 = vpop.f32.mrf.mxu1  ;;  %v1240_v21 = vpop.f32.mrf.mxu0 }
 0x26f   : > { %v1287_v18 = vand.u32 2147483647, %v3518_v15  ;;  %v1289_v25 = vand.u32 2147483647, %v3521_v45  ;;  %v3526_v27 = vadd.f32 %v1145_v20, %v3512_v14  ;;  %v3529_v30 = vadd.f32 %v1240_v21, %v3515_v22 }
 0x271   : > { %v1307_v31 = vsub.f32 0.0, %v1287_v18  ;;  %v1309_v34 = vsub.f32 0.0, %v1289_v25  ;;  %v1149_v35 = vpop.f32.mrf.mxu1  ;;  %v1244_v39 = vpop.f32.mrf.mxu0  ;;  %v1288_v40 = vand.u32 2147483647, %v3526_v27  ;;  %v1290_v61 = vand.u32 2147483647, %v3529_v30 }
 0x272   : > { %v3534_v43 = vadd.f32 %v1149_v35, %v3506_v12  ;;  %v3537_v44 = vadd.f32 %v1244_v39, %v3509_v50  ;;  %v1491_v18 = vld [vmem:[#allocation11 + $0x7] ss:$8 sm:$0xf] }
 0x273   : > { %v1327_v41 = vmul.f32 1.442695, %v1307_v31  ;;  %v1331_v42 = vmul.f32 1.442695, %v1309_v34  ;;  %v1151_v47 = vpop.f32.mrf.mxu1  ;;  %v1246_v17 = vpop.f32.mrf.mxu0  ;;  %v1308_v49 = vsub.f32 0.0, %v1288_v40  ;;  %v1310_v2 = vsub.f32 0.0, %v1290_v61 }
 0x274   : > { %v3540_v29 = vadd.f32 %v1151_v47, %v3512_v14  ;;  %v3543_v26 = vadd.f32 %v1246_v17, %v3515_v22  ;;  %v1291_v19 = vand.u32 2147483647, %v3534_v43  ;;  %v1293_v54 = vand.u32 2147483647, %v3537_v44 }
 0x275   : > { %2474 = vpow2.f32 %v1327_v41  ;;  %v1155_v36 = vpop.f32.mrf.mxu1  ;;  %v1329_v52 = vmul.f32 1.442695, %v1308_v49  ;;  %v1333_v53 = vmul.f32 1.442695, %v1310_v2  ;;  %v1250_v16 = vpop.f32.mrf.mxu0  ;;  %v3570_v17 = vrot.slane %v1448_v7, %v3350_v46 }
 0x276   : > { %2476 = vpow2.f32 %v1331_v42  ;;  %v1311_v0 = vsub.f32 0.0, %v1291_v19  ;;  %v1292_v1 = vand.u32 2147483647, %v3540_v29  ;;  %v1313_v23 = vsub.f32 0.0, %v1293_v54 }
 0x277   : > { %v1157_v38 = vpop.f32.mrf.mxu1  ;;  %2478 = vpow2.f32 %v1329_v52  ;;  %v1294_v32 = vand.u32 2147483647, %v3543_v26  ;;  %v3550_v56 = vadd.f32 %v1155_v36, %v3506_v12  ;;  %v3553_v59 = vadd.f32 %v1250_v16, %v3509_v50  ;;  %v1252_v8 = vpop.f32.mrf.mxu0 }
 0x278   : > { %2480 = vpow2.f32 %v1333_v53  ;;  %v1335_v6 = vmul.f32 1.442695, %v1311_v0  ;;  %v1312_v58 = vsub.f32 0.0, %v1292_v1  ;;  %v1339_v60 = vmul.f32 1.442695, %v1313_v23 }
 0x279   : > { %v1314_v62 = vsub.f32 0.0, %v1294_v32  ;;  %v1295_v3 = vand.u32 2147483647, %v3550_v56  ;;  %v1161_v11 = vpop.f32.mrf.mxu1  ;;  %v1297_v24 = vand.u32 2147483647, %v3553_v59  ;;  %v3558_v33 = vadd.f32 %v1157_v38, %v3512_v14  ;;  %v1256_v35 = vpop.f32.mrf.mxu0 }
 0x27a   : > { %2482 = vpow2.f32 %v1335_v6  ;;  %v1337_v63 = vmul.f32 1.442695, %v1312_v58  ;;  %v3561_v5 = vadd.f32 %v1252_v8, %v3515_v22  ;;  %v3564_v57 = vadd.f32 %v1161_v11, %v3506_v12  ;;  %v3581_v53 = vld [vmem:[#allocation11 + $0x20] ss:$8 sm:$0x3] }
 0x27b   : > { %2484 = vpow2.f32 %v1339_v60  ;;  %v1341_v10 = vmul.f32 1.442695, %v1314_v62  ;;  %v1315_v4 = vsub.f32 0.0, %v1295_v3  ;;  %v1317_v37 = vsub.f32 0.0, %v1297_v24  ;;  %v1163_v55 = vpop.f32.mrf.mxu1  ;;  %v1258_v38 = vpop.f32.mrf.mxu0 }
 0x27c   : > { %2486 = vpow2.f32 %v1337_v63  ;;  %v1296_v13 = vand.u32 2147483647, %v3558_v33  ;;  %v1298_v21 = vand.u32 2147483647, %v3561_v5  ;;  %v1299_v31 = vand.u32 2147483647, %v3564_v57 }
 0x27d   : > { %2488 = vpow2.f32 %v1341_v10  ;;  %v1343_v28 = vmul.f32 1.442695, %v1315_v4  ;;  %v1347_v20 = vmul.f32 1.442695, %v1317_v37  ;;  %v3573_v49 = vrot.slane %v1491_v18, %v3350_v46 }
 0x27e   : > { %v1316_v25 = vsub.f32 0.0, %v1296_v13  ;;  %v1318_v34 = vsub.f32 0.0, %v1298_v21  ;;  %v1319_v61 = vsub.f32 0.0, %v1299_v31  ;;  %v1167_v41 = vpop.f32.mrf.mxu1  ;;  %v3576_v36 = vrot.slane %v1448_v7, %v3500_v51 }
 0x27f   : > { %2490 = vpow2.f32 %v1343_v28  ;;  %v3579_v52 = vrot.slane %v1491_v18, %v3500_v51  ;;  %v3584_v16 = vrot.slane %v1448_v7, %v3353_v48  ;;  %v3587_v0 = vrot.slane %v1491_v18, %v3353_v48 }
 0x280   : > { %2492 = vpow2.f32 %v1347_v20  ;;  %v1345_v40 = vmul.f32 1.442695, %v1316_v25  ;;  %v1349_v2 = vmul.f32 1.442695, %v1318_v34  ;;  %v3590_v1 = vrot.slane %v1448_v7, %v3503_v9  ;;  %v3595_v58 = vpop.f32.mrf.mxu1  ;;  %v1262_v20 = vpop.f32.mrf.mxu0 }
 0x281   : > { %v3593_v32 = vrot.slane %v1491_v18, %v3503_v9  ;;  %v1351_v6 = vmul.f32 1.442695, %v1319_v61  ;;  %v3598_v62 = vadd.f32 %v1256_v35, %v3509_v50  ;;  %v3602_v3 = vrot.slane %v3581_v53, %v3350_v46 }
 0x282   : > { %v2475_v39 = vpop.eup %2474  ;;  %2494 = vpow2.f32 %v1345_v40  ;;  %v1267_v11 = vmax.f32 %v3518_v15, 0.0  ;;  %v3606_v9 = vadd.f32 %v1163_v55, %v3512_v14  ;;  %v3609_v63 = vadd.f32 %v1258_v38, %v3515_v22 }
 0x283   : > { %v2477_v42 = vpop.eup %2476  ;;  %v1367_v47 = vadd.f32 1.0, %v2475_v39  ;;  %v1269_v4 = vmax.f32 %v3521_v45, 0.0  ;;  %v3614_v46 = vadd.f32 %v1167_v41, %v3506_v12  ;;  %v1268_v28 = vmax.f32 %v3526_v27, 0.0 }
 0x284   : > { %v1369_v19 = vadd.f32 1.0, %v2477_v42  ;;  %v2479_v54 = vpop.eup %2478  ;;  %v1270_v13 = vmax.f32 %v3529_v30, 0.0  ;;  %v1271_v18 = vmax.f32 %v3534_v43, 0.0  ;;  %v1301_v31 = vand.u32 2147483647, %v3598_v62 }
 0x285   : > { %2496 = vlog2.f32 %v1367_v47  ;;  %v2481_v23 = vpop.eup %2480  ;;  %v1368_v51 = vadd.f32 1.0, %v2479_v54  ;;  %v1300_v35 = vand.u32 2147483647, %v3606_v9  ;;  %v1302_v39 = vand.u32 2147483647, %v3609_v63 }
 0x286   : > { %2498 = vlog2.f32 %v1369_v19  ;;  %v1370_v60 = vadd.f32 1.0, %v2481_v23  ;;  %v1303_v41 = vand.u32 2147483647, %v3614_v46  ;;  %v3643_v42 = vadd.f32 %v1262_v20, %v3509_v50 }
 0x287   : > { %2500 = vpow2.f32 %v1349_v2  ;;  %v2483_v8 = vpop.eup %2482  ;;  %v1853_v24 = vpop.f32.mrf.mxu1 }
 0x288   : > { %2502 = vlog2.f32 %v1368_v51  ;;  %v2485_v10 = vpop.eup %2484  ;;  %v1371_v37 = vadd.f32 1.0, %v2483_v8  ;;  %v1854_v47 = vadd.f32 %v1853_v24, %v3602_v3 }
 0x289   : > { %2504 = vlog2.f32 %v1370_v60  ;;  %v2487_v7 = vpop.eup %2486  ;;  %v1373_v55 = vadd.f32 1.0, %v2485_v10  ;;  %v3620_v21 = vpop.f32.mrf.mxu1 }
 0x28a   : > { %2506 = vpow2.f32 %v1351_v6  ;;  %v2489_v12 = vpop.eup %2488  ;;  %v1372_v25 = vadd.f32 1.0, %v2487_v7 }
 0x28b   : > { %2508 = vlog2.f32 %v1371_v37  ;;  %v1859_v40 = vpop.f32.mrf.mxu1 }
 0x28c   : > { %2510 = vlog2.f32 %v1373_v55  ;;  %v2491_v61 = vpop.eup %2490 }
 0x28d   : > { %2512 = vlog2.f32 %v1372_v25 }
 0x28e   : > { %2817 = shalt.err (!%p2814_p5)
}
 0x28f   : > { %s2818_s0 = scalar_lea.hbm %s3627_s25, 1280  ;;  %s2822_s14 = scalar_lea.hbm %s4033_s7, 2560 }
 0x290   : > { %p2819_p8 = scmp.ne.s32.totalorder %s3627_s25, %s2818_s0  ;;  %p2823_p12 = scmp.lt.s32.totalorder %s3627_s25, %s4033_s7 }
 0x291   : > { %p2824_p7 = scmp.lt.s32.totalorder %s2822_s14, %s2818_s0 }
 0x292   : > { %p2820_p11 = pnand %p2819_p8, %p4067_p10 }
 0x293   : > { %p2825_p9 = por %p2824_p7, %p2823_p12 }
 0x294   : > { %p2821_p13 = pneg %p2820_p11 }
 0x296   : > { %p2826_p0 = pnand %p2825_p9, %p2821_p13 }
 0x298   : > { %2829 = shalt.err (!%p2826_p0)
}
 0x299   : > { %s2986_s18 = smov 256   ;;  %s2987_s17 = smov 16   ;;  %v2493_v50 = vpop.eup %2492  ;;  %v1374_v54 = vadd.f32 1.0, %v2489_v12  ;;  %v3677_v23 = vpop.f32.mrf.mxu1  ;;  %v1375_v51 = vadd.f32 1.0, %v2491_v61  ;;  %v1321_v60 = vsub.f32 0.0, %v1301_v31  ;;  %v3683_v8 = vadd.f32 %v3595_v58, %v3512_v14 }
 0x29a   : > { %2275 = dma.vmem_to_hbm [thread:$0]  (%p4067_p10), %s3631_s24, 1280, %s3627_s25, %s3648_s23, %s2986_s18, %s2986_s18, %s2987_s17   ;;  %v1377_v24 = vadd.f32 1.0, %v2493_v50  ;;  %v1320_v37 = vsub.f32 0.0, %v1300_v35  ;;  %v1322_v7 = vsub.f32 0.0, %v1302_v39  ;;  %v2495_v20 = vpop.eup %2494  ;;  %v1323_v14 = vsub.f32 0.0, %v1303_v41 }
 0x29b   : > { %s1931_s3 = sshll.u32 %s3340_s15, 4  ;;  %s3687_s24 = scalar_lea.vmem [#allocation17], %s2252_s4  ;;  %v1865_v55 = vpop.f32.mrf.mxu1  ;;  %v1305_v58 = vand.u32 2147483647, %v3643_v42  ;;  %v1860_v12 = vadd.f32 %v1859_v40, %v3602_v3  ;;  %v2497_v31 = vpop.eup %2496  ;;  %2514 = vlog2.f32 %v1374_v54  ;;  %v1376_v61 = vadd.f32 1.0, %v2495_v20  ;;  %s3690_s3 = int_to_ptr.vmem [resolvable:$true] %s1931_s3 }
 0x29c   : > { %1882 = vst [vmem:[%s3687_s24] sm:$0xff] %v1854_v47  ;;  %v1866_v25 = vadd.f32 %v1865_v55, %v3602_v3  ;;  %s1903_s15 = scalar_lea.sflag [#allocation4], %s3254_s26  ;;  %s2830_s4 = scalar_lea.vmem %s3690_s3, 640 }
 0x29d   : > { %v3698_v50 = vpop.f32.mrf.mxu1  ;;  %p2831_p3 = scmp.ne.s32.totalorder %s3690_s3, %s2830_s4  ;;  %s2988_s25 = smov [#allocation13]  }
 0x29e   : > { %s2834_s27 = sshll.u32 %s2988_s25, 4  ;;  %s2835_s27 = int_to_ptr.vmem [resolvable:$false] %s2834_s27 }
 0x29f   : > { %p2832_p2 = pnand %p2831_p3, %p4067_p10  ;;  %s2836_s0 = scalar_lea.vmem %s2835_s27, 1280 }
 0x2a0   : > { %p2837_p6 = scmp.lt.s32.totalorder %s3690_s3, %s2835_s27  ;;  %p2838_p1 = scmp.lt.s32.totalorder %s2836_s0, %s2830_s4 }
 0x2a1   : > { %p2833_p4 = pneg %p2832_p2 }
 0x2a2   : > { %p2839_p5 = por %p2838_p1, %p2837_p6 }
 0x2a4   : > { %p2840_p8 = pnand %p2839_p5, %p2833_p4 }
 0x2a6   : > { %2843 = shalt.err (!%p2840_p8)
}
 0x2a7   : > { %s2844_s5 = scalar_lea.hbm %s3639_s2, 640  ;;  %s2848_s22 = scalar_lea.hbm %s4032_s6, 1280 }
 0x2a8   : > { %p2845_p11 = scmp.ne.s32.totalorder %s3639_s2, %s2844_s5  ;;  %p2849_p7 = scmp.lt.s32.totalorder %s3639_s2, %s4032_s6 }
 0x2a9   : > { %p2850_p9 = scmp.lt.s32.totalorder %s2848_s22, %s2844_s5 }
 0x2aa   : > { %p2846_p13 = pnand %p2845_p11, %p4067_p10 }
 0x2ab   : > { %p2851_p0 = por %p2850_p9, %p2849_p7 }
 0x2ac   : > { %p2847_p12 = pneg %p2846_p13 }
 0x2ae   : > { %p2852_p3 = pnand %p2851_p0, %p2847_p12 }
 0x2b0   : > { %2855 = shalt.err (!%p2852_p3)
}
 0x2b1   : > { %s2989_s4 = smov 128   ;;  %s2990_s27 = smov 8   ;;  %v2499_v39 = vpop.eup %2498  ;;  %v1388_v40 = vmul.f32 0.6931472, %v2497_v31  ;;  %2516 = vlog2.f32 %v1375_v51  ;;  %v1355_v41 = vmul.f32 1.442695, %v1321_v60  ;;  %v1264_v10 = vpop.f32.mrf.mxu0 }
 0x2b2   : > { %2274 = dma.vmem_to_hbm [thread:$0]  (%p4067_p10), %s3690_s3, 640, %s3639_s2, %s1903_s15, %s2989_s4, %s2989_s4, %s2990_s27   ;;  %v1304_v54 = vand.u32 2147483647, %v3683_v8  ;;  %v2501_v55 = vpop.eup %2500  ;;  %v1392_v20 = vmul.f32 0.6931472, %v2499_v39  ;;  %2518 = vlog2.f32 %v1377_v24  ;;  %v1325_v34 = vsub.f32 0.0, %v1305_v58  ;;  %v1871_v31 = vpop.f32.mrf.mxu1 }
 0x2b3   : > { %1883 = vst [vmem:[%s3687_s24 + $0x10] sm:$0xff] %v1860_v12  ;;  %1884 = vst [vmem:[%s3687_s24 + $0x20] sm:$0xff] %v1866_v25  ;;  %v1353_v35 = vmul.f32 1.442695, %v1320_v37  ;;  %v1357_v47 = vmul.f32 1.442695, %v1322_v7  ;;  %v2503_v6 = vpop.eup %2502  ;;  %v1427_v38 = vadd.f32 %v1388_v40, %v1267_v11  ;;  %2520 = vlog2.f32 %v1376_v61  ;;  %s3924_s29 = scalar_lea.hbm %s4035_s9, %s2246_s21 }
 0x2b4   : > { %v1378_v19 = vadd.f32 1.0, %v2501_v55  ;;  %v1359_v2 = vmul.f32 1.442695, %v1323_v14  ;;  %v2505_v51 = vpop.eup %2504  ;;  %v1429_v60 = vadd.f32 %v1392_v20, %v1269_v4  ;;  %v1390_v12 = vmul.f32 0.6931472, %v2503_v6  ;;  %s2253_s2 = smul.u32 160, %s3254_s26 }
 0x2b5   : > { %v1872_v24 = vadd.f32 %v1871_v31, %v3602_v3  ;;  %v2507_v37 = vpop.eup %2506  ;;  %v1470_v7 = vmul.f32 %v3570_v17, %v1427_v38  ;;  %v1394_v25 = vmul.f32 0.6931472, %v2505_v51  ;;  %v1324_v39 = vsub.f32 0.0, %v1304_v54  ;;  %s1982_s15 = sshll.u32 %s3687_s24, 4  ;;  %s1918_s21 = scalar_lea.sflag [#allocation18], %s3254_s26  ;;  %s3929_s15 = int_to_ptr.vmem [resolvable:$true] %s1982_s15 }
 0x2b6   : > { %v3733_v15 = vadd.f32 %v1264_v10, %v3515_v22  ;;  %v2509_v11 = vpop.eup %2508  ;;  %v1472_v14 = vmul.f32 %v3576_v36, %v1429_v60  ;;  %v1428_v58 = vadd.f32 %v1390_v12, %v1268_v28  ;;  %v1379_v45 = vadd.f32 1.0, %v2507_v37  ;;  %s3858_s3 = scalar_lea.vmem [#allocation16], %s2253_s2  ;;  %s2856_s14 = scalar_lea.vmem %s3929_s15, 1280 }
 0x2b7   : > { %2522 = vpow2.f32 %v1355_v41  ;;  %1885 = vst [vmem:[%s3687_s24 + $0x30] sm:$0xff] %v1872_v24  ;;  %v2511_v4 = vpop.eup %2510  ;;  %v3740_v6 = vadd.f32 %v3573_v49, %v1470_v7  ;;  %v1430_v38 = vadd.f32 %v1394_v25, %v1270_v13  ;;  %v1396_v61 = vmul.f32 0.6931472, %v2509_v11  ;;  %p2857_p2 = scmp.ne.s32.totalorder %s3929_s15, %s2856_s14  ;;  %s2991_s22 = smov [#allocation17]  }
 0x2b8   : > { %2524 = vlog2.f32 %v1378_v19  ;;  %v2513_v22 = vpop.eup %2512  ;;  %v3745_v10 = vadd.f32 %v3579_v52, %v1472_v14  ;;  %v1471_v40 = vmul.f32 %v3584_v16, %v1428_v58  ;;  %v1400_v27 = vmul.f32 0.6931472, %v2511_v4  ;;  %s2860_s19 = sshll.u32 %s2991_s22, 4  ;;  %s2861_s19 = int_to_ptr.vmem [resolvable:$false] %s2860_s19 }
 0x2b9   : > { %2526 = vlog2.f32 %v1379_v45  ;;  %v1553_v28 = vand.u32 2147483647, %v3740_v6  ;;  %v1473_v41 = vmul.f32 %v3590_v1, %v1430_v38  ;;  %v1431_v54 = vadd.f32 %v1396_v61, %v1271_v18  ;;  %v2515_v24 = vpop.eup %2514  ;;  %p2858_p4 = pnand %p2857_p2, %p4067_p10  ;;  %s2862_s25 = scalar_lea.vmem %s2861_s19, 2560 }
 0x2ba   : > { %v3752_v55 = vmul.f32 1.442695, %v1325_v34  ;;  %v1555_v30 = vand.u32 2147483647, %v3745_v10  ;;  %v3756_v13 = vadd.f32 %v3587_v0, %v1471_v40  ;;  %v4068_v19 = vmax.f32 %v3537_v44, 0.0  ;;  %p2863_p1 = scmp.lt.s32.totalorder %s3929_s15, %s2861_s19  ;;  %p2864_p5 = scmp.lt.s32.totalorder %s2862_s25, %s2856_s14 }
 0x2bb   : > { %2528 = vpow2.f32 %v1353_v35  ;;  %v1573_v31 = vsub.f32 0.0, %v1553_v28  ;;  %v3761_v51 = vadd.f32 %v3593_v32, %v1473_v41  ;;  %v1474_v60 = vmul.f32 %v3570_v17, %v1431_v54  ;;  %p2859_p6 = pneg %p2858_p4 }
 0x2bc   : > { %v1433_v20 = vadd.f32 %v1400_v27, %v4068_v19  ;;  %v1398_v12 = vmul.f32 0.6931472, %v2513_v22  ;;  %v1575_v43 = vsub.f32 0.0, %v1555_v30  ;;  %v1554_v18 = vand.u32 2147483647, %v3756_v13  ;;  %p2865_p8 = por %p2864_p5, %p2863_p1 }
 0x2bd   : > { %2530 = vpow2.f32 %v1357_v47  ;;  %v1593_v37 = vmul.f32 1.442695, %v1573_v31  ;;  %v1556_v7 = vand.u32 2147483647, %v3761_v51  ;;  %v3768_v44 = vadd.f32 %v3573_v49, %v1474_v60 }
 0x2be   : > { %v1476_v34 = vmul.f32 %v3576_v36, %v1433_v20  ;;  %2532 = vpow2.f32 %v1359_v2  ;;  %v2517_v35 = vpop.eup %2516  ;;  %v1597_v25 = vmul.f32 1.442695, %v1575_v43  ;;  %v1574_v11 = vsub.f32 0.0, %v1554_v18  ;;  %p2866_p11 = pnand %p2865_p8, %p2859_p6 }
 0x2bf   : > { %v4069_v58 = vmax.f32 %v3540_v29, 0.0  ;;  %v2519_v4 = vpop.eup %2518  ;;  %2534 = vpow2.f32 %v1593_v37  ;;  %v1576_v47 = vsub.f32 0.0, %v1556_v7  ;;  %v1557_v38 = vand.u32 2147483647, %v3768_v44 }
 0x2c0   : > { %v3771_v14 = vadd.f32 %v3579_v52, %v1476_v34  ;;  %v1361_v61 = vmul.f32 1.442695, %v1324_v39  ;;  %2536 = vpow2.f32 %v1597_v25  ;;  %v1595_v22 = vmul.f32 1.442695, %v1574_v11  ;;  %v2521_v27 = vpop.eup %2520 }
 0x2c1   : > { %v1432_v45 = vadd.f32 %v1398_v12, %v4069_v58  ;;  %v1306_v2 = vand.u32 2147483647, %v3733_v15  ;;  %v1599_v28 = vmul.f32 1.442695, %v1576_v47  ;;  %v1577_v41 = vsub.f32 0.0, %v1557_v38 }
 0x2c2   : > { %v1559_v40 = vand.u32 2147483647, %v3771_v14  ;;  %v1402_v30 = vmul.f32 0.6931472, %v2515_v24  ;;  %2538 = vpow2.f32 %v1595_v22  ;;  %v1404_v19 = vmul.f32 0.6931472, %v2517_v35 }
 0x2c3   : > { %v1475_v54 = vmul.f32 %v3584_v16, %v1432_v45  ;;  %v1408_v20 = vmul.f32 0.6931472, %v2519_v4  ;;  %2540 = vpow2.f32 %v1599_v28  ;;  %v1601_v60 = vmul.f32 1.442695, %v1577_v41 }
 0x2c4   : > { %v1579_v29 = vsub.f32 0.0, %v1559_v40  ;;  %v2523_v31 = vpop.eup %2522  ;;  %v4070_v12 = vmax.f32 %v3543_v26, 0.0  ;;  %v4071_v37 = vmax.f32 %v3550_v56, 0.0  ;;  %v4072_v24 = vmax.f32 %v3553_v59, 0.0 }
 0x2c5   : > { %v3780_v39 = vadd.f32 %v3587_v0, %v1475_v54  ;;  %v2525_v18 = vpop.eup %2524  ;;  %v1406_v11 = vmul.f32 0.6931472, %v2521_v27  ;;  %2542 = vpow2.f32 %v1601_v60  ;;  %v1326_v4 = vsub.f32 0.0, %v1306_v2 }
 0x2c6   : > { %v1434_v43 = vadd.f32 %v1402_v30, %v4070_v12  ;;  %v1605_v34 = vmul.f32 1.442695, %v1579_v29  ;;  %v1435_v7 = vadd.f32 %v1404_v19, %v4071_v37  ;;  %v1437_v25 = vadd.f32 %v1408_v20, %v4072_v24  ;;  %v2527_v35 = vpop.eup %2526 }
 0x2c7   : > { %v1558_v58 = vand.u32 2147483647, %v3780_v39  ;;  %v4073_v38 = vmax.f32 %v3558_v33, 0.0  ;;  %v1410_v27 = vmul.f32 0.6931472, %v2525_v18  ;;  %v1381_v30 = vadd.f32 1.0, %v2523_v31 }
 0x2c8   : > { %v1477_v45 = vmul.f32 %v3590_v1, %v1434_v43  ;;  %2544 = vpow2.f32 %v1605_v34  ;;  %v1478_v26 = vmul.f32 %v3570_v17, %v1435_v7  ;;  %v1480_v47 = vmul.f32 %v3576_v36, %v1437_v25  ;;  %v3794_v22 = vpop.eup %2528 }
 0x2c9   : > { %v1436_v56 = vadd.f32 %v1406_v11, %v4073_v38  ;;  %v1578_v59 = vsub.f32 0.0, %v1558_v58  ;;  %v1412_v28 = vmul.f32 0.6931472, %v2527_v35  ;;  %v4074_v20 = vmax.f32 %v3561_v5, 0.0 }
 0x2ca   : > { %v3797_v40 = vadd.f32 %v3593_v32, %v1477_v45  ;;  %v3800_v41 = vadd.f32 %v3573_v49, %v1478_v26  ;;  %v3803_v2 = vadd.f32 %v3579_v52, %v1480_v47  ;;  %v3806_v29 = vpop.eup %2530  ;;  %2546 = vpow2.f32 %v3752_v55 }
 0x2cb   : > { %v1479_v54 = vmul.f32 %v3584_v16, %v1436_v56  ;;  %v1603_v33 = vmul.f32 1.442695, %v1578_v59  ;;  %v1438_v60 = vadd.f32 %v1410_v27, %v4074_v20  ;;  %v3812_v12 = vpop.eup %2532  ;;  %2548 = vpow2.f32 %v1361_v61 }
 0x2cc   : > { %v1560_v19 = vand.u32 2147483647, %v3797_v40  ;;  %v1561_v43 = vand.u32 2147483647, %v3800_v41  ;;  %v1563_v18 = vand.u32 2147483647, %v3803_v2  ;;  %v2535_v24 = vpop.eup %2534 }
 0x2cd   : > { %v1365_v34 = vmul.f32 1.442695, %v1326_v4  ;;  %2550 = vpow2.f32 %v1603_v33  ;;  %v3817_v37 = vadd.f32 %v3587_v0, %v1479_v54  ;;  %v1481_v7 = vmul.f32 %v3590_v1, %v1438_v60  ;;  %v2537_v11 = vpop.eup %2536  ;;  %v3831_v33 = vpop.f32.mrf.mxu1 }
 0x2ce   : > { %v1580_v31 = vsub.f32 0.0, %v1560_v19  ;;  %v1581_v5 = vsub.f32 0.0, %v1561_v43  ;;  %v4075_v25 = vmax.f32 %v3564_v57, 0.0  ;;  %2552 = vlog2.f32 %v1381_v30 }
 0x2cf   : > { %v1633_v35 = vadd.f32 1.0, %v2535_v24  ;;  %v1562_v45 = vand.u32 2147483647, %v3817_v37  ;;  %v1635_v61 = vadd.f32 1.0, %v2537_v11  ;;  %v3824_v4 = vadd.f32 %v3593_v32, %v1481_v7  ;;  %v2539_v26 = vpop.eup %2538 }
 0x2d0   : > { %v1439_v55 = vadd.f32 %v1412_v28, %v4075_v25  ;;  %v1607_v58 = vmul.f32 1.442695, %v1580_v31  ;;  %2554 = vpow2.f32 %v1365_v34  ;;  %v1609_v47 = vmul.f32 1.442695, %v1581_v5  ;;  %v2541_v59 = vpop.eup %2540 }
 0x2d1   : > { %2556 = vlog2.f32 %v1633_v35  ;;  %v1583_v38 = vsub.f32 0.0, %v1563_v18  ;;  %v1634_v57 = vadd.f32 1.0, %v2539_v26  ;;  %v1582_v27 = vsub.f32 0.0, %v1562_v45 }
 0x2d2   : > { %v1482_v56 = vmul.f32 %v3570_v17, %v1439_v55  ;;  %2558 = vlog2.f32 %v1635_v61  ;;  %v1564_v28 = vand.u32 2147483647, %v3824_v4  ;;  %v1636_v54 = vadd.f32 1.0, %v2541_v59  ;;  %v2543_v19 = vpop.eup %2542  ;;  %v1877_v55 = vpop.f32.mrf.mxu1 }
 0x2d3   : > { %2560 = vpow2.f32 %v1607_v58  ;;  %v3835_v60 = vrot.slane %v3581_v53, %v3353_v48  ;;  %v1637_v18 = vadd.f32 1.0, %v2543_v19  ;;  %v1613_v34 = vmul.f32 1.442695, %v1583_v38 }
 0x2d4   : > { %v3829_v30 = vadd.f32 %v3573_v49, %v1482_v56  ;;  %2562 = vlog2.f32 %v1634_v57  ;;  %v1584_v20 = vsub.f32 0.0, %v1564_v28  ;;  %v1611_v24 = vmul.f32 1.442695, %v1582_v27 }
 0x2d5   : > { %v2545_v43 = vpop.eup %2544  ;;  %2564 = vlog2.f32 %v1636_v54  ;;  %v1878_v48 = vadd.f32 %v1877_v55, %v3602_v3  ;;  %v1856_v58 = vadd.f32 %v3620_v21, %v3835_v60  ;;  %v1380_v61 = vadd.f32 1.0, %v3794_v22 }
 0x2d6   : > { %v1565_v31 = vand.u32 2147483647, %v3829_v30  ;;  %v1639_v7 = vadd.f32 1.0, %v2545_v43  ;;  %2566 = vpow2.f32 %v1609_v47  ;;  %v1615_v5 = vmul.f32 1.442695, %v1584_v20 }
 0x2d7   : > { %2568 = vlog2.f32 %v1637_v18  ;;  %v2547_v11 = vpop.eup %2546  ;;  %1886 = vst [vmem:[%s3687_s24 + $0x40] sm:$0xff] %v1878_v48  ;;  %v1382_v38 = vadd.f32 1.0, %v3806_v29  ;;  %v1281_v3 = vmax.f32 %v3598_v62, 0.0  ;;  %v1383_v59 = vadd.f32 1.0, %v3812_v12 }
 0x2d8   : > { %v1585_v25 = vsub.f32 0.0, %v1565_v31  ;;  %2570 = vlog2.f32 %v1639_v7  ;;  %v2549_v53 = vpop.eup %2548  ;;  %v1385_v21 = vadd.f32 1.0, %v2547_v11  ;;  %v1887_v27 = vmul.f32 1.442695, %v1856_v58 }
 0x2d9   : > { %2572 = vpow2.f32 %v1613_v34  ;;  %v1384_v22 = vadd.f32 1.0, %v2549_v53  ;;  %v1862_v19 = vadd.f32 %v3677_v23, %v3835_v60  ;;  %v1533_v29 = vmax.f32 %v3740_v6, 0.0 }
 0x2da   : > { %v1617_v35 = vmul.f32 1.442695, %v1585_v25  ;;  %v2551_v45 = vpop.eup %2550  ;;  %2574 = vpow2.f32 %v1611_v24  ;;  %v1535_v62 = vmax.f32 %v3745_v10, 0.0  ;;  %v1534_v34 = vmax.f32 %v3756_v13, 0.0 }
 0x2db   : > { %v2553_v26 = vpop.eup %2552  ;;  %v1638_v47 = vadd.f32 1.0, %v2551_v45  ;;  %2576 = vpow2.f32 %v1615_v5  ;;  %v1536_v13 = vmax.f32 %v3761_v51, 0.0  ;;  %v1889_v53 = vmul.f32 1.442695, %v1862_v19  ;;  %v1879_v51 = vpop.f32.mrf.mxu1 }
 0x2dc   : > { %2578 = vpow2.f32 %v1617_v35  ;;  %v1416_v56 = vmul.f32 0.6931472, %v2553_v26  ;;  %v1868_v26 = vadd.f32 %v3698_v50, %v3835_v60 }
 0x2dd   : > { %v2555_v57 = vpop.eup %2554  ;;  %2580 = vlog2.f32 %v1638_v47 }
 0x2de   : > { %v2557_v28 = vpop.eup %2556  ;;  %v1441_v54 = vadd.f32 %v1416_v56, %v1281_v3  ;;  %2582 = vlog2.f32 %v1380_v61  ;;  %v1386_v23 = vadd.f32 1.0, %v2555_v57  ;;  %v1537_v3 = vmax.f32 %v3768_v44, 0.0 }
 0x2df   : > { %v2559_v20 = vpop.eup %2558  ;;  %v1654_v43 = vmul.f32 0.6931472, %v2557_v28  ;;  %2584 = vlog2.f32 %v1382_v38  ;;  %v1539_v57 = vmax.f32 %v3771_v14, 0.0  ;;  %v1874_v44 = vadd.f32 %v3831_v33, %v3835_v60 }
 0x2e0   : > { %v2561_v18 = vpop.eup %2560  ;;  %v1658_v12 = vmul.f32 0.6931472, %v2559_v20  ;;  %v1484_v31 = vmul.f32 %v3576_v36, %v1441_v54  ;;  %2586 = vlog2.f32 %v1383_v59  ;;  %v1891_v33 = vmul.f32 1.442695, %v1868_v26 }
 0x2e1   : > { %v2563_v7 = vpop.eup %2562  ;;  %v1693_v24 = vadd.f32 %v1654_v43, %v1533_v29  ;;  %v1640_v5 = vadd.f32 1.0, %v2561_v18  ;;  %2588 = vlog2.f32 %v1385_v21  ;;  %v1880_v43 = vadd.f32 %v1879_v51, %v3835_v60 }
 0x2e2   : > { %v2565_v25 = vpop.eup %2564  ;;  %v1695_v55 = vadd.f32 %v1658_v12, %v1535_v62  ;;  %v1656_v6 = vmul.f32 0.6931472, %v2563_v7  ;;  %v3854_v11 = vadd.f32 %v3579_v52, %v1484_v31  ;;  %2590 = vlog2.f32 %v1384_v22 }
 0x2e3   : > { %v2567_v10 = vpop.eup %2566  ;;  %1713 = vst [vmem:[%s3858_s3] sm:$0xff] %v1693_v24  ;;  %v1660_v48 = vmul.f32 0.6931472, %v2565_v25  ;;  %2592 = vlog2.f32 %v1640_v5  ;;  %v1280_v12 = vmax.f32 %v3606_v9, 0.0  ;;  %v1282_v31 = vmax.f32 %v3609_v63, 0.0 }
 0x2e4   : > { %v2569_v35 = vpop.eup %2568  ;;  %1715 = vst [vmem:[%s3858_s3 + $0x10] sm:$0xff] %v1695_v55  ;;  %v1694_v58 = vadd.f32 %v1656_v6, %v1534_v34  ;;  %v1641_v45 = vadd.f32 1.0, %v2567_v10  ;;  %v1567_v61 = vand.u32 2147483647, %v3854_v11  ;;  %2594 = vlog2.f32 %v1386_v23 }
 0x2e5   : > { %v2571_v47 = vpop.eup %2570  ;;  %v1696_v38 = vadd.f32 %v1660_v48, %v1536_v13  ;;  %v1662_v56 = vmul.f32 0.6931472, %v2569_v35  ;;  %v1538_v24 = vmax.f32 %v3780_v39, 0.0  ;;  %v1893_v60 = vmul.f32 1.442695, %v1874_v44 }
 0x2e6   : > { %v2573_v59 = vpop.eup %2572  ;;  %1714 = vst [vmem:[%s3858_s3 + $0x8] sm:$0xff] %v1694_v58  ;;  %v1666_v21 = vmul.f32 0.6931472, %v2571_v47  ;;  %2596 = vlog2.f32 %v1641_v45  ;;  %v1587_v28 = vsub.f32 0.0, %v1567_v61  ;;  %v1283_v55 = vmax.f32 %v3614_v46, 0.0 }
 0x2e7   : > { %v2575_v54 = vpop.eup %2574  ;;  %1716 = vst [vmem:[%s3858_s3 + $0x18] sm:$0xff] %v1696_v38  ;;  %v1697_v22 = vadd.f32 %v1662_v56, %v1537_v3  ;;  %v1643_v50 = vadd.f32 1.0, %v2573_v59  ;;  %2598 = vpow2.f32 %v1887_v27  ;;  %v1895_v9 = vmul.f32 1.442695, %v1880_v43 }
 0x2e8   : > { %v2577_v19 = vpop.eup %2576  ;;  %v1699_v20 = vadd.f32 %v1666_v21, %v1539_v57  ;;  %v1642_v29 = vadd.f32 1.0, %v2575_v54  ;;  %2600 = vpow2.f32 %v1889_v53  ;;  %v1621_v18 = vmul.f32 1.442695, %v1587_v28 }
 0x2e9   : > { %v2579_v14 = vpop.eup %2578  ;;  %1717 = vst [vmem:[%s3858_s3 + $0x20] sm:$0xff] %v1697_v22  ;;  %2602 = vlog2.f32 %v1643_v50  ;;  %v1644_v62 = vadd.f32 1.0, %v2577_v19  ;;  %v1285_v63 = vmax.f32 %v3643_v42, 0.0  ;;  %v1284_v39 = vmax.f32 %v3683_v8, 0.0 }
 0x2ea   : > { %v2581_v34 = vpop.eup %2580  ;;  %1719 = vst [vmem:[%s3858_s3 + $0x30] sm:$0xff] %v1699_v20  ;;  %2604 = vlog2.f32 %v1642_v29  ;;  %v1645_v27 = vadd.f32 1.0, %v2579_v14  ;;  %v1286_v26 = vmax.f32 %v3733_v15, 0.0  ;;  %v1540_v42 = vmax.f32 %v3797_v40, 0.0 }
 0x2eb   : > { %v2583_v7 = vpop.eup %2582  ;;  %v1664_v5 = vmul.f32 0.6931472, %v2581_v34  ;;  %2606 = vlog2.f32 %v1644_v62  ;;  %v1541_v57 = vmax.f32 %v3800_v41, 0.0  ;;  %v1543_v44 = vmax.f32 %v3803_v2, 0.0 }
 0x2ec   : > { %v2585_v23 = vpop.eup %2584  ;;  %2608 = vlog2.f32 %v1645_v27  ;;  %v1414_v25 = vmul.f32 0.6931472, %v2583_v7  ;;  %v1542_v41 = vmax.f32 %v3817_v37, 0.0  ;;  %v1544_v62 = vmax.f32 %v3824_v4, 0.0 }
 0x2ed   : > { %v2587_v6 = vpop.eup %2586  ;;  %v1698_v10 = vadd.f32 %v1664_v5, %v1538_v24  ;;  %2610 = vpow2.f32 %v1621_v18  ;;  %v1418_v13 = vmul.f32 0.6931472, %v2585_v23  ;;  %v1545_v4 = vmax.f32 %v3829_v30, 0.0 }
 0x2ee   : > { %v2589_v48 = vpop.eup %2588  ;;  %v1440_v53 = vadd.f32 %v1414_v25, %v1280_v12  ;;  %v1420_v35 = vmul.f32 0.6931472, %v2587_v6  ;;  %2612 = vpow2.f32 %v1891_v33 }
 0x2ef   : > { %v2591_v58 = vpop.eup %2590  ;;  %1718 = vst [vmem:[%s3858_s3 + $0x28] sm:$0xff] %v1698_v10  ;;  %v1442_v45 = vadd.f32 %v1418_v13, %v1282_v31  ;;  %v1424_v61 = vmul.f32 0.6931472, %v2589_v48  ;;  %2614 = vpow2.f32 %v1893_v60 }
 0x2f0   : > { %v2593_v46 = vpop.eup %2592  ;;  %v1483_v47 = vmul.f32 %v3584_v16, %v1440_v53  ;;  %v1443_v38 = vadd.f32 %v1420_v35, %v1283_v55  ;;  %v1422_v3 = vmul.f32 0.6931472, %v2591_v58  ;;  %2616 = vpow2.f32 %v1895_v9 }
 0x2f1   : > { %v1668_v56 = vmul.f32 0.6931472, %v2593_v46  ;;  %v1485_v51 = vmul.f32 %v3590_v1, %v1442_v45  ;;  %v1445_v8 = vadd.f32 %v1424_v61, %v1285_v63  ;;  %v2595_v59 = vpop.eup %2594 }
 0x2f2   : > { %v3888_v21 = vadd.f32 %v3587_v0, %v1483_v47  ;;  %v1486_v28 = vmul.f32 %v3570_v17, %v1443_v38  ;;  %v1444_v54 = vadd.f32 %v1422_v3, %v1284_v39 }
 0x2f3   : > { %v2597_v22 = vpop.eup %2596  ;;  %v1700_v50 = vadd.f32 %v1668_v56, %v1540_v42  ;;  %v3893_v40 = vadd.f32 %v3593_v32, %v1485_v51  ;;  %v1488_v19 = vmul.f32 %v3576_v36, %v1445_v8 }
 0x2f4   : > { %v2599_v20 = vpop.eup %2598  ;;  %v1670_v29 = vmul.f32 0.6931472, %v2597_v22  ;;  %v1566_v43 = vand.u32 2147483647, %v3888_v21  ;;  %v3899_v17 = vadd.f32 %v3573_v49, %v1486_v28  ;;  %v1487_v36 = vmul.f32 %v3584_v16, %v1444_v54 }
 0x2f5   : > { %v2601_v14 = vpop.eup %2600  ;;  %1720 = vst [vmem:[%s3858_s3 + $0x38] sm:$0xff] %v1700_v50  ;;  %v1568_v2 = vand.u32 2147483647, %v3893_v40  ;;  %v3905_v18 = vadd.f32 %v3579_v52, %v1488_v19  ;;  %1897 = vst [vmem:[%s3687_s24 + $0x8] sm:$0xff] %v2599_v20  ;;  %v1426_v49 = vmul.f32 0.6931472, %v2595_v59 }
 0x2f6   : > { %v2603_v12 = vpop.eup %2602  ;;  %v1701_v37 = vadd.f32 %v1670_v29, %v1541_v57  ;;  %v1586_v34 = vsub.f32 0.0, %v1566_v43  ;;  %v1569_v27 = vand.u32 2147483647, %v3899_v17  ;;  %1898 = vst [vmem:[%s3687_s24 + $0x18] sm:$0xff] %v2601_v14  ;;  %v3915_v23 = vadd.f32 %v3587_v0, %v1487_v36 }
 0x2f7   : > { %v2605_v31 = vpop.eup %2604  ;;  %v1674_v33 = vmul.f32 0.6931472, %v2603_v12  ;;  %v1588_v7 = vsub.f32 0.0, %v1568_v2  ;;  %v1571_v24 = vand.u32 2147483647, %v3905_v18  ;;  %v1446_v47 = vadd.f32 %v1426_v49, %v1286_v26 }
 0x2f8   : > { %v2607_v52 = vpop.eup %2606  ;;  %1721 = vst [vmem:[%s3858_s3 + $0x40] sm:$0xff] %v1701_v37  ;;  %v1672_v5 = vmul.f32 0.6931472, %v2605_v31  ;;  %v1619_v16 = vmul.f32 1.442695, %v1586_v34  ;;  %v1589_v60 = vsub.f32 0.0, %v1569_v27 }
 0x2f9   : > { %v2609_v25 = vpop.eup %2608  ;;  %v1703_v55 = vadd.f32 %v1674_v33, %v1543_v44  ;;  %v1676_v9 = vmul.f32 0.6931472, %v2607_v52  ;;  %v1623_v6 = vmul.f32 1.442695, %v1588_v7  ;;  %v1591_v10 = vsub.f32 0.0, %v1571_v24 }
 0x2fa   : > { %v2611_v30 = vpop.eup %2610  ;;  %v1702_v13 = vadd.f32 %v1672_v5, %v1542_v41  ;;  %v1678_v63 = vmul.f32 0.6931472, %v2609_v25  ;;  %2618 = vpow2.f32 %v1619_v16  ;;  %v1625_v48 = vmul.f32 1.442695, %v1589_v60 }
 0x2fb   : > { %v2613_v53 = vpop.eup %2612  ;;  %1723 = vst [vmem:[%s3858_s3 + $0x50] sm:$0xff] %v1703_v55  ;;  %v1704_v35 = vadd.f32 %v1676_v9, %v1544_v62  ;;  %v1647_v0 = vadd.f32 1.0, %v2611_v30  ;;  %2620 = vpow2.f32 %v1623_v6  ;;  %v1629_v39 = vmul.f32 1.442695, %v1591_v10 }
 0x2fc   : > { %v2615_v58 = vpop.eup %2614  ;;  %1722 = vst [vmem:[%s3858_s3 + $0x48] sm:$0xff] %v1702_v13  ;;  %v1705_v45 = vadd.f32 %v1678_v63, %v1545_v4  ;;  %2622 = vpow2.f32 %v1625_v48  ;;  %v1570_v61 = vand.u32 2147483647, %v3915_v23  ;;  %1899 = vst [vmem:[%s3687_s24 + $0x28] sm:$0xff] %v2613_v53  ;;  %v1489_v3 = vmul.f32 %v3590_v1, %v1446_v47 }
 0x2fd   : > { %v2617_v46 = vpop.eup %2616  ;;  %1724 = vst [vmem:[%s3858_s3 + $0x58] sm:$0xff] %v1704_v35  ;;  %2624 = vlog2.f32 %v1647_v0  ;;  %1900 = vst [vmem:[%s3687_s24 + $0x38] sm:$0xff] %v2615_v58 }
 0x2fe   : > { %1725 = vst [vmem:[%s3858_s3 + $0x60] sm:$0xff] %v1705_v45  ;;  %2626 = vpow2.f32 %v1629_v39  ;;  %v1590_v38 = vsub.f32 0.0, %v1570_v61  ;;  %1901 = vst [vmem:[%s3687_s24 + $0x48] sm:$0xff] %v2617_v46 }
 0x2ff   : > { %2869 = shalt.err (!%p2866_p11)
}
 0x300   : > { %s2870_s24 = scalar_lea.hbm %s3924_s29, 1280  ;;  %s2874_s27 = scalar_lea.hbm %s4035_s9, 2560 }
 0x301   : > { %p2871_p13 = scmp.ne.s32.totalorder %s3924_s29, %s2870_s24  ;;  %p2875_p9 = scmp.lt.s32.totalorder %s3924_s29, %s4035_s9 }
 0x302   : > { %p2876_p0 = scmp.lt.s32.totalorder %s2874_s27, %s2870_s24 }
 0x303   : > { %p2872_p12 = pnand %p2871_p13, %p4067_p10 }
 0x304   : > { %p2877_p3 = por %p2876_p0, %p2875_p9 }
 0x305   : > { %p2873_p7 = pneg %p2872_p12 }
 0x307   : > { %p2878_p2 = pnand %p2877_p3, %p2873_p7 }
 0x309   : > { %2881 = shalt.err (!%p2878_p2)
}
 0x30a   : > { %2277 = dma.vmem_to_hbm [thread:$0]  (%p4067_p10), %s3929_s15, 1280, %s3924_s29, %s1918_s21, %s2986_s18, %s2986_s18, %s2987_s17   ;;  %v1627_v1 = vmul.f32 1.442695, %v1590_v38  ;;  %v1532_v15 = vadd.f32 %v3593_v32, %v1489_v3  ;;  %v2619_v56 = vpop.eup %2618  ;;  %v1547_v44 = vmax.f32 %v3854_v11, 0.0  ;;  %v1546_v36 = vmax.f32 %v3888_v21, 0.0 }
 0x30b   : > { %v2621_v8 = vpop.eup %2620  ;;  %v1646_v59 = vadd.f32 1.0, %v2619_v56  ;;  %v1548_v37 = vmax.f32 %v3893_v40, 0.0  ;;  %v1549_v49 = vmax.f32 %v3899_v17, 0.0  ;;  %v1551_v21 = vmax.f32 %v3905_v18, 0.0  ;;  %s2247_s18 = smul.u32 2560, %s3066_s13  ;;  %s1965_s17 = sshll.u32 %s3858_s3, 4  ;;  %s3982_s17 = int_to_ptr.vmem [resolvable:$true] %s1965_s17 }
 0x30c   : > { %2628 = vpow2.f32 %v1627_v1  ;;  %v1572_v26 = vand.u32 2147483647, %v1532_v15  ;;  %v2623_v57 = vpop.eup %2622  ;;  %v1648_v28 = vadd.f32 1.0, %v2621_v8  ;;  %v1550_v17 = vmax.f32 %v3915_v23, 0.0  ;;  %s2882_s21 = scalar_lea.vmem %s3982_s17, 2560  ;;  %s2992_s13 = smov [#allocation16]  }
 0x30d   : > { %v2625_v54 = vpop.eup %2624  ;;  %v1649_v22 = vadd.f32 1.0, %v2623_v57  ;;  %v1552_v25 = vmax.f32 %v1532_v15, 0.0  ;;  %s3980_s29 = scalar_lea.hbm %s4034_s8, %s2247_s18  ;;  %p2883_p4 = scmp.ne.s32.totalorder %s3982_s17, %s2882_s21 }
 0x30e   : > { %v1592_v42 = vsub.f32 0.0, %v1572_v26  ;;  %v2627_v50 = vpop.eup %2626  ;;  %v1682_v19 = vmul.f32 0.6931472, %v2625_v54  ;;  %s2886_s14 = sshll.u32 %s2992_s13, 4  ;;  %s2887_s14 = int_to_ptr.vmem [resolvable:$false] %s2886_s14 }
 0x30f   : > { %v1651_v32 = vadd.f32 1.0, %v2627_v50  ;;  %p2884_p6 = pnand %p2883_p4, %p4067_p10  ;;  %s2888_s22 = scalar_lea.vmem %s2887_s14, 5120 }
 0x310   : > { %v1631_v51 = vmul.f32 1.442695, %v1592_v42  ;;  %v1707_v20 = vadd.f32 %v1682_v19, %v1547_v44  ;;  %p2889_p5 = scmp.lt.s32.totalorder %s3982_s17, %s2887_s14  ;;  %p2890_p8 = scmp.lt.s32.totalorder %s2888_s22, %s2882_s21 }
 0x311   : > { %p2885_p1 = pneg %p2884_p6 }
 0x312   : > { %2630 = vpow2.f32 %v1631_v51  ;;  %1727 = vst [vmem:[%s3858_s3 + $0x70] sm:$0xff] %v1707_v20  ;;  %p2891_p11 = por %p2890_p8, %p2889_p5 }
 0x313   : > { %2632 = vlog2.f32 %v1646_v59 }
 0x314   : > { %2634 = vlog2.f32 %v1648_v28  ;;  %p2892_p13 = pnand %p2891_p11, %p2885_p1 }
 0x315   : > { %2636 = vlog2.f32 %v1649_v22 }
 0x316   : > { %2638 = vlog2.f32 %v1651_v32 }
 0x319   : > { %v2629_v29 = vpop.eup %2628 }
 0x31a   : > { %v1650_v41 = vadd.f32 1.0, %v2629_v29 }
 0x31c   : > { %2640 = vlog2.f32 %v1650_v41 }
 0x31f   : > { %v2631_v43 = vpop.eup %2630 }
 0x320   : > { %v2633_v14 = vpop.eup %2632  ;;  %v1652_v62 = vadd.f32 1.0, %v2631_v43 }
 0x321   : > { %v2635_v2 = vpop.eup %2634  ;;  %v1680_v11 = vmul.f32 0.6931472, %v2633_v14 }
 0x322   : > { %v2637_v12 = vpop.eup %2636  ;;  %v1684_v34 = vmul.f32 0.6931472, %v2635_v2  ;;  %2642 = vlog2.f32 %v1652_v62 }
 0x323   : > { %v1706_v27 = vadd.f32 %v1680_v11, %v1546_v36  ;;  %v1686_v31 = vmul.f32 0.6931472, %v2637_v12  ;;  %v2639_v33 = vpop.eup %2638 }
 0x324   : > { %v1708_v4 = vadd.f32 %v1684_v34, %v1548_v37  ;;  %v1690_v24 = vmul.f32 0.6931472, %v2639_v33 }
 0x325   : > { %1726 = vst [vmem:[%s3858_s3 + $0x68] sm:$0xff] %v1706_v27  ;;  %v1709_v7 = vadd.f32 %v1686_v31, %v1549_v49 }
 0x326   : > { %1728 = vst [vmem:[%s3858_s3 + $0x78] sm:$0xff] %v1708_v4  ;;  %v1711_v40 = vadd.f32 %v1690_v24, %v1551_v21 }
 0x327   : > { %1729 = vst [vmem:[%s3858_s3 + $0x80] sm:$0xff] %v1709_v7 }
 0x328   : > { %1731 = vst [vmem:[%s3858_s3 + $0x90] sm:$0xff] %v1711_v40 }
 0x329   : > { %v2641_v52 = vpop.eup %2640 }
 0x32a   : > { %v1688_v5 = vmul.f32 0.6931472, %v2641_v52 }
 0x32c   : > { %v1710_v16 = vadd.f32 %v1688_v5, %v1550_v17 }
 0x32e   : > { %1730 = vst [vmem:[%s3858_s3 + $0x88] sm:$0xff] %v1710_v16 }
 0x32f   : > { %v2643_v60 = vpop.eup %2642 }
 0x330   : > { %v1692_v55 = vmul.f32 0.6931472, %v2643_v60 }
 0x332   : > { %v1712_v18 = vadd.f32 %v1692_v55, %v1552_v25 }
 0x334   : > { %1732 = vst [vmem:[%s3858_s3 + $0x98] sm:$0xff] %v1712_v18 }
 0x335   : > { %2895 = shalt.err (!%p2892_p13)
}
 0x336   : > { %s2896_s19 = scalar_lea.hbm %s3980_s29, 2560  ;;  %s2900_s24 = scalar_lea.hbm %s4034_s8, 5120 }
 0x337   : > { %p2897_p12 = scmp.ne.s32.totalorder %s3980_s29, %s2896_s19  ;;  %p2901_p0 = scmp.lt.s32.totalorder %s3980_s29, %s4034_s8 }
 0x338   : > { %p2902_p3 = scmp.lt.s32.totalorder %s2900_s24, %s2896_s19 }
 0x339   : > { %p2898_p7 = pnand %p2897_p12, %p4067_p10 }
 0x33a   : > { %p2903_p2 = por %p2902_p3, %p2901_p0 }
 0x33b   : > { %p2899_p9 = pneg %p2898_p7 }
 0x33d   : > { %p2904_p4 = pnand %p2903_p2, %p2899_p9 }
 0x33f   : > { %2907 = shalt.err (!%p2904_p4)
}
 0x340   : > { %s2993_s27 = smov 512   ;;  %s2994_s2 = smov 32  }
 0x341   : > { %2276 = dma.vmem_to_hbm [thread:$0]  (%p4067_p10), %s3982_s17, 2560, %s3980_s29, %s3648_s23, %s2993_s27, %s2993_s27, %s2994_s2  }
 0x342 PF: > { %s1997_s0 = sand.u32 1, %s2958_s30   ;;  %p4076_p6 = scmp.ne.s32.totalorder %s4047_s16, 0 }
 0x343   : > { %p4077_p1 = scmp.ge.s32.totalorder %s2970_s12, 2  ;;  %s1998_s18 = scalar_lea.sflag [#allocation4], %s1997_s0 }
 0x345   : > { %p2303_p5 = pnand %p4077_p1, %p4076_p6 }
 0x347   : > { %p2304_p8 = pneg %p2303_p5 }
 0x349   : > { %2945 = dma.done.wait (%p2304_p8), %s1998_s18, 640  }
 0x34a   : > { %2947 = vsyncadd (%p2304_p8), %s1998_s18, 4294966656  ;;  %s4078_s15 = sadd.s32 4294967294, %s2970_s12  }
 0x34b   : > { %s2006_s5 = sand.u32 1, %s4078_s15  }
 0x34c   : > { %s2007_s21 = scalar_lea.sflag [#allocation15], %s2006_s5 }
 0x34d   : > { %2949 = dma.done.wait (%p2304_p8), %s2007_s21, 3840  }
 0x34e   : > { %2951 = vsyncadd (%p2304_p8), %s2007_s21, 4294963456  ;;  %s2025_s28 = scalar_lea.sflag [#allocation18], %s1997_s0 }
 0x34f   : > { %2953 = dma.done.wait (%p2304_p8), %s2025_s28, 1280  }
 0x350   : > { %2955 = vsyncadd (%p2304_p8), %s2025_s28, 4294966016  ;;  %s4079_s23 = sld [smem:[#allocation27_spill]]  ;;  %p34_p10 = scmp.ge.s32.totalorder %s3147_s20, 4  }
 0x351   : > { %s4080_s30 = smov %s2962_s10  ;;  %s4081_s10 = smov %s2966_s11 }
 0x352   : > { %s4083_s12 = smov %s3147_s20  ;;  %36 = sbr.rel (!%p34_p10) target bundleno = 19 (0x13), region = 174 }
 0x356   : > { %s4082_s11 = smov %s4079_s23 }
 0x357   :  { %2030 = vsyncpa [#allocation3], 1 }
 0x358   :  { %2032 = vsyncpa [#allocation3 + $0x1], 1 }
 0x359   :  { %2033 = vsyncpa [#allocation6], 1 }
 0x35a   :  { %2035 = vsyncpa [#allocation6 + $0x1], 1 }
 0x35b   :  { %2036 = vsyncpa [#allocation9], 1 }
 0x35c   :  { %2037 = vsyncpa [#allocation12], 1 }
 0x35d   :  { %2038 = vsyncpa [#allocation4], 1 }
 0x35e   :  { %2040 = vsyncpa [#allocation4 + $0x1], 1 }
 0x35f   :  { %2041 = vsyncpa [#allocation15], 1 }
 0x360   :  { %2043 = vsyncpa [#allocation15 + $0x1], 1 }
 0x361   :  { %2044 = vsyncpa [#allocation18], 1 }
 0x362   :  { %2046 = vsyncpa [#allocation18 + $0x1], 1 }

</bundles_post_ra>
